<compile_context>
chip_gen: v6e
topology: v6e:2x2x1
jax: 0.10.0
libtpu: 0.0.40
codegen_flags: <defaults>
</compile_context>

<pallas_src>
import numpy as np
import jax
import jax.numpy as jnp
from jax import lax
from jax.experimental import pallas as pl
from jax.experimental.pallas import tpu as pltpu


def make_lstm_kernel(num_layers: int, max_time: int, batch: int):
    """Build the Pallas kernel body (num_layers / max_time / batch are static)."""

    def kernel(x_ref, wgh_ref, wgx_ref, bg_ref, wo_ref, bo_ref, out_ref,
               h_sc, c_sc, xw_sc):
        # ---- hoisted input projection (independent of the recurrence) ------
        # xw[t*B:(t+1)*B, :] = x[t] @ wgx + bg   (bias folded in once)
        xw_sc[...] = (jnp.dot(x_ref[...], wgx_ref[...],
                              preferred_element_type=jnp.float32)
                      + bg_ref[...])

        # ---- init hidden / cell state --------------------------------------
        h_sc[...] = jnp.zeros_like(h_sc)
        c_sc[...] = jnp.zeros_like(c_sc)

        # ---- serial recurrence ----------------------------------------------
        def step(t, carry):
            start = pl.multiple_of(t * batch, batch)
            xw_t = xw_sc[pl.ds(start, batch), :]            # (B, H)
            g = (jnp.dot(h_sc[...], wgh_ref[...],
                         preferred_element_type=jnp.float32)
                 + xw_t)                                    # (B, H)
            s = jax.nn.sigmoid(g)                           # f == i == o
            ch = jnp.tanh(g)                                # cell_helper
            c = (c_sc[...] + ch) * s                        # cell*f + helper*i
            h = jnp.tanh(c) * s                             # tanh(cell) * o
            c_sc[...] = c
            h_sc[...] = h
            return carry

        for _layer in range(num_layers):                    # layers replay the sequence
            lax.fori_loop(0, max_time, step, 0, unroll=True)

        # ---- final output projection (only the last step is returned) ------
        out_ref[...] = (jnp.dot(h_sc[...], wo_ref[...],
                                preferred_element_type=jnp.float32)
                        + bo_ref[...])

    return kernel


def embed_lstm_forward(x, wg, bg, wo, bo, num_layers: int):
    """x: (T, B, D) float32.  wg: (H, D+H), bg: (H,), wo: (D, H), bo: (D,)."""
    T, B, D = x.shape
    H = wg.shape[0]
    # combined = cat(hidden, input) -> first H columns of wg act on hidden
    wgh = jnp.asarray(wg[:, :H].T, jnp.float32)    # (H, H)
    wgx = jnp.asarray(wg[:, H:].T, jnp.float32)    # (D, H)
    woT = jnp.asarray(wo.T, jnp.float32)           # (H, D)
    x2 = jnp.asarray(x, jnp.float32).reshape(T * B, D)   # layout-only reshape

    kernel = make_lstm_kernel(num_layers, T, B)
    vm = pltpu.MemorySpace.VMEM
    return pl.pallas_call(
        kernel,
        out_shape=jax.ShapeDtypeStruct((B, D), jnp.float32),
        in_specs=[pl.BlockSpec(memory_space=vm)] * 6,
        out_specs=pl.BlockSpec(memory_space=vm),
        scratch_shapes=[pltpu.VMEM((B, H), jnp.float32),      # hidden
                        pltpu.VMEM((B, H), jnp.float32),      # cell
                        pltpu.VMEM((T * B, H), jnp.float32)], # precomputed x@wgx+bg
    )(x2, wgh, wgx,
      jnp.asarray(bg, jnp.float32).reshape(1, H),
      woT,
      jnp.asarray(bo, jnp.float32).reshape(1, D))


def reference_forward(x, wg, bg, wo, bo, num_layers: int):
    """Pure-JAX reference mirroring the PyTorch forward exactly."""
    T, B, D = x.shape
    h = jnp.zeros((B, wg.shape[0]), jnp.float32)
    c = jnp.zeros((B, wg.shape[0]), jnp.float32)
    out = None
    for _layer in range(num_layers):
        for t in range(T):
            combined = jnp.concatenate([h, x[t]], axis=1)   # (B, H+D)
            g = combined @ wg.T + bg
            s = jax.nn.sigmoid(g)
            ch = jnp.tanh(g)
            c = c * s + ch * s
            h = jnp.tanh(c) * s
            out = h @ wo.T + bo
    return out


if __name__ == "__main__":
    # small shapes consistent with the module
    input_size, hidden_size = 16, 32
    batch_size, max_time, num_layers = 8, 8, 2

    key = jax.random.PRNGKey(0)
    kx, kg, kgb, ko, kob = jax.random.split(key, 5)

    # deterministic nn.Linear-style init: U(-1/sqrt(fan_in), 1/sqrt(fan_in))
    fan_g = input_size + hidden_size
    wg = jax.random.uniform(kg, (hidden_size, fan_g), jnp.float32,
                            -1.0 / np.sqrt(fan_g), 1.0 / np.sqrt(fan_g))
    bg = jax.random.uniform(kgb, (hidden_size,), jnp.float32,
                            -1.0 / np.sqrt(fan_g), 1.0 / np.sqrt(fan_g))
    fan_o = hidden_size
    wo = jax.random.uniform(ko, (input_size, hidden_size), jnp.float32,
                            -1.0 / np.sqrt(fan_o), 1.0 / np.sqrt(fan_o))
    bo = jax.random.uniform(kob, (input_size,), jnp.float32,
                            -1.0 / np.sqrt(fan_o), 1.0 / np.sqrt(fan_o))

    x = jax.random.normal(kx, (max_time, batch_size, input_size), jnp.float32)

    out = embed_lstm_forward(x, wg, bg, wo, bo, num_layers)
    out = jax.block_until_ready(out)

    ref = reference_forward(x, wg, bg, wo, bo, num_layers)
    np.testing.assert_allclose(np.asarray(out), np.asarray(ref),
                               rtol=1e-5, atol=1e-5)
    print("KERNEL_OK")
</pallas_src>

<mosaic_0001>
module attributes {stable_mosaic.version = 11 : i64} {
  func.func @kernel(%arg0: memref<64x16xf32, #tpu.memory_space<vmem>>, %arg1: memref<32x32xf32, #tpu.memory_space<vmem>>, %arg2: memref<16x32xf32, #tpu.memory_space<vmem>>, %arg3: memref<1x32xf32, #tpu.memory_space<vmem>>, %arg4: memref<32x16xf32, #tpu.memory_space<vmem>>, %arg5: memref<1x16xf32, #tpu.memory_space<vmem>>, %arg6: memref<8x16xf32, #tpu.memory_space<vmem>>, %arg7: memref<8x32xf32, #tpu.memory_space<vmem>>, %arg8: memref<8x32xf32, #tpu.memory_space<vmem>>, %arg9: memref<64x32xf32, #tpu.memory_space<vmem>>) attributes {dimension_semantics = [], scalar_prefetch = 0 : i64, scratch_operands = 3 : i64, tpu.core_type = #tpu.core_type<tc>} {
    %c0 = arith.constant 0 : index
    %c0_0 = arith.constant 0 : index
    %0 = vector.load %arg0[%c0, %c0_0] : memref<64x16xf32, #tpu.memory_space<vmem>>, vector<64x16xf32>
    %c0_1 = arith.constant 0 : index
    %c0_2 = arith.constant 0 : index
    %1 = vector.load %arg2[%c0_1, %c0_2] : memref<16x32xf32, #tpu.memory_space<vmem>>, vector<16x32xf32>
    %cst = arith.constant dense<0.000000e+00> : vector<64x32xf32>
    %2 = tpu.matmul %0, %1, %cst {dimension_numbers = #tpu.dot_dimension_numbers<[1], [0], [0], [1], [0, 0, 1, 1], [], []>} : vector<64x16xf32>, vector<16x32xf32>, vector<64x32xf32> -> vector<64x32xf32>
    %c0_3 = arith.constant 0 : index
    %c0_4 = arith.constant 0 : index
    %3 = vector.load %arg3[%c0_3, %c0_4] : memref<1x32xf32, #tpu.memory_space<vmem>>, vector<1x32xf32>
    %4 = vector.broadcast %3 : vector<1x32xf32> to vector<64x32xf32>
    %5 = arith.addf %2, %4 : vector<64x32xf32>
    %c0_5 = arith.constant 0 : index
    %c0_6 = arith.constant 0 : index
    %6 = vector.load %arg9[%c0_5, %c0_6] : memref<64x32xf32, #tpu.memory_space<vmem>>, vector<64x32xf32>
    tpu.vector_store %arg9[%c0_5, %c0_6], %5 {strides = array<i32>} : memref<64x32xf32, #tpu.memory_space<vmem>>, vector<64x32xf32>,
    %cst_7 = arith.constant 0.000000e+00 : f32
    %7 = vector.broadcast %cst_7 : f32 to vector<8x32xf32>
    %c0_8 = arith.constant 0 : index
    %c0_9 = arith.constant 0 : index
    %8 = vector.load %arg7[%c0_8, %c0_9] : memref<8x32xf32, #tpu.memory_space<vmem>>, vector<8x32xf32>
    tpu.vector_store %arg7[%c0_8, %c0_9], %7 {strides = array<i32>} : memref<8x32xf32, #tpu.memory_space<vmem>>, vector<8x32xf32>,
    %cst_10 = arith.constant 0.000000e+00 : f32
    %9 = vector.broadcast %cst_10 : f32 to vector<8x32xf32>
    %c0_11 = arith.constant 0 : index
    %c0_12 = arith.constant 0 : index
    %10 = vector.load %arg8[%c0_11, %c0_12] : memref<8x32xf32, #tpu.memory_space<vmem>>, vector<8x32xf32>
    tpu.vector_store %arg8[%c0_11, %c0_12], %9 {strides = array<i32>} : memref<8x32xf32, #tpu.memory_space<vmem>>, vector<8x32xf32>,
    %c0_i32 = arith.constant 0 : i32
    %c8_i32 = arith.constant 8 : i32
    %11 = arith.muli %c0_i32, %c8_i32 : i32
    %12 = tpu.assume_multiple %11, 8 : i32
    %13 = arith.index_cast %12 : i32 to index
    %c0_13 = arith.constant 0 : index
    %14 = vector.load %arg9[%13, %c0_13] : memref<64x32xf32, #tpu.memory_space<vmem>>, vector<8x32xf32>
    %c0_14 = arith.constant 0 : index
    %c0_15 = arith.constant 0 : index
    %15 = vector.load %arg7[%c0_14, %c0_15] : memref<8x32xf32, #tpu.memory_space<vmem>>, vector<8x32xf32>
    %c0_16 = arith.constant 0 : index
    %c0_17 = arith.constant 0 : index
    %16 = vector.load %arg1[%c0_16, %c0_17] : memref<32x32xf32, #tpu.memory_space<vmem>>, vector<32x32xf32>
    %cst_18 = arith.constant dense<0.000000e+00> : vector<8x32xf32>
    %17 = tpu.matmul %15, %16, %cst_18 {dimension_numbers = #tpu.dot_dimension_numbers<[1], [0], [0], [1], [0, 0, 1, 1], [], []>} : vector<8x32xf32>, vector<32x32xf32>, vector<8x32xf32> -> vector<8x32xf32>
    %18 = arith.addf %17, %14 : vector<8x32xf32>
    %19 = arith.negf %18 : vector<8x32xf32>
    %20 = math.exp %19 : vector<8x32xf32>
    %cst_19 = arith.constant 1.000000e+00 : f32
    %21 = vector.broadcast %cst_19 : f32 to vector<8x32xf32>
    %22 = arith.addf %21, %20 : vector<8x32xf32>
    %23 = arith.divf %21, %22 : vector<8x32xf32>
    %24 = math.tanh %18 : vector<8x32xf32>
    %c0_20 = arith.constant 0 : index
    %c0_21 = arith.constant 0 : index
    %25 = vector.load %arg8[%c0_20, %c0_21] : memref<8x32xf32, #tpu.memory_space<vmem>>, vector<8x32xf32>
    %26 = arith.addf %25, %24 : vector<8x32xf32>
    %27 = arith.mulf %26, %23 : vector<8x32xf32>
    %28 = math.tanh %27 : vector<8x32xf32>
    %29 = arith.mulf %28, %23 : vector<8x32xf32>
    %c0_22 = arith.constant 0 : index
    %c0_23 = arith.constant 0 : index
    %30 = vector.load %arg8[%c0_22, %c0_23] : memref<8x32xf32, #tpu.memory_space<vmem>>, vector<8x32xf32>
    tpu.vector_store %arg8[%c0_22, %c0_23], %27 {strides = array<i32>} : memref<8x32xf32, #tpu.memory_space<vmem>>, vector<8x32xf32>,
    %c0_24 = arith.constant 0 : index
    %c0_25 = arith.constant 0 : index
    %31 = vector.load %arg7[%c0_24, %c0_25] : memref<8x32xf32, #tpu.memory_space<vmem>>, vector<8x32xf32>
    tpu.vector_store %arg7[%c0_24, %c0_25], %29 {strides = array<i32>} : memref<8x32xf32, #tpu.memory_space<vmem>>, vector<8x32xf32>,
    %c1_i32 = arith.constant 1 : i32
    %c8_i32_26 = arith.constant 8 : i32
    %32 = arith.muli %c1_i32, %c8_i32_26 : i32
    %33 = tpu.assume_multiple %32, 8 : i32
    %34 = arith.index_cast %33 : i32 to index
    %c0_27 = arith.constant 0 : index
    %35 = vector.load %arg9[%34, %c0_27] : memref<64x32xf32, #tpu.memory_space<vmem>>, vector<8x32xf32>
    %c0_28 = arith.constant 0 : index
    %c0_29 = arith.constant 0 : index
    %36 = vector.load %arg7[%c0_28, %c0_29] : memref<8x32xf32, #tpu.memory_space<vmem>>, vector<8x32xf32>
    %c0_30 = arith.constant 0 : index
    %c0_31 = arith.constant 0 : index
    %37 = vector.load %arg1[%c0_30, %c0_31] : memref<32x32xf32, #tpu.memory_space<vmem>>, vector<32x32xf32>
    %cst_32 = arith.constant dense<0.000000e+00> : vector<8x32xf32>
    %38 = tpu.matmul %36, %37, %cst_32 {dimension_numbers = #tpu.dot_dimension_numbers<[1], [0], [0], [1], [0, 0, 1, 1], [], []>} : vector<8x32xf32>, vector<32x32xf32>, vector<8x32xf32> -> vector<8x32xf32>
    %39 = arith.addf %38, %35 : vector<8x32xf32>
    %40 = arith.negf %39 : vector<8x32xf32>
    %41 = math.exp %40 : vector<8x32xf32>
    %cst_33 = arith.constant 1.000000e+00 : f32
    %42 = vector.broadcast %cst_33 : f32 to vector<8x32xf32>
    %43 = arith.addf %42, %41 : vector<8x32xf32>
    %44 = arith.divf %42, %43 : vector<8x32xf32>
    %45 = math.tanh %39 : vector<8x32xf32>
    %c0_34 = arith.constant 0 : index
    %c0_35 = arith.constant 0 : index
    %46 = vector.load %arg8[%c0_34, %c0_35] : memref<8x32xf32, #tpu.memory_space<vmem>>, vector<8x32xf32>
    %47 = arith.addf %46, %45 : vector<8x32xf32>
    %48 = arith.mulf %47, %44 : vector<8x32xf32>
    %49 = math.tanh %48 : vector<8x32xf32>
    %50 = arith.mulf %49, %44 : vector<8x32xf32>
    %c0_36 = arith.constant 0 : index
    %c0_37 = arith.constant 0 : index
    %51 = vector.load %arg8[%c0_36, %c0_37] : memref<8x32xf32, #tpu.memory_space<vmem>>, vector<8x32xf32>
    tpu.vector_store %arg8[%c0_36, %c0_37], %48 {strides = array<i32>} : memref<8x32xf32, #tpu.memory_space<vmem>>, vector<8x32xf32>,
    %c0_38 = arith.constant 0 : index
    %c0_39 = arith.constant 0 : index
    %52 = vector.load %arg7[%c0_38, %c0_39] : memref<8x32xf32, #tpu.memory_space<vmem>>, vector<8x32xf32>
    tpu.vector_store %arg7[%c0_38, %c0_39], %50 {strides = array<i32>} : memref<8x32xf32, #tpu.memory_space<vmem>>, vector<8x32xf32>,
    %c2_i32 = arith.constant 2 : i32
    %c8_i32_40 = arith.constant 8 : i32
    %53 = arith.muli %c2_i32, %c8_i32_40 : i32
    %54 = tpu.assume_multiple %53, 8 : i32
    %55 = arith.index_cast %54 : i32 to index
    %c0_41 = arith.constant 0 : index
    %56 = vector.load %arg9[%55, %c0_41] : memref<64x32xf32, #tpu.memory_space<vmem>>, vector<8x32xf32>
    %c0_42 = arith.constant 0 : index
    %c0_43 = arith.constant 0 : index
    %57 = vector.load %arg7[%c0_42, %c0_43] : memref<8x32xf32, #tpu.memory_space<vmem>>, vector<8x32xf32>
    %c0_44 = arith.constant 0 : index
    %c0_45 = arith.constant 0 : index
    %58 = vector.load %arg1[%c0_44, %c0_45] : memref<32x32xf32, #tpu.memory_space<vmem>>, vector<32x32xf32>
    %cst_46 = arith.constant dense<0.000000e+00> : vector<8x32xf32>
    %59 = tpu.matmul %57, %58, %cst_46 {dimension_numbers = #tpu.dot_dimension_numbers<[1], [0], [0], [1], [0, 0, 1, 1], [], []>} : vector<8x32xf32>, vector<32x32xf32>, vector<8x32xf32> -> vector<8x32xf32>
    %60 = arith.addf %59, %56 : vector<8x32xf32>
    %61 = arith.negf %60 : vector<8x32xf32>
    %62 = math.exp %61 : vector<8x32xf32>
    %cst_47 = arith.constant 1.000000e+00 : f32
    %63 = vector.broadcast %cst_47 : f32 to vector<8x32xf32>
    %64 = arith.addf %63, %62 : vector<8x32xf32>
    %65 = arith.divf %63, %64 : vector<8x32xf32>
    %66 = math.tanh %60 : vector<8x32xf32>
    %c0_48 = arith.constant 0 : index
    %c0_49 = arith.constant 0 : index
    %67 = vector.load %arg8[%c0_48, %c0_49] : memref<8x32xf32, #tpu.memory_space<vmem>>, vector<8x32xf32>
    %68 = arith.addf %67, %66 : vector<8x32xf32>
    %69 = arith.mulf %68, %65 : vector<8x32xf32>
    %70 = math.tanh %69 : vector<8x32xf32>
    %71 = arith.mulf %70, %65 : vector<8x32xf32>
    %c0_50 = arith.constant 0 : index
    %c0_51 = arith.constant 0 : index
    %72 = vector.load %arg8[%c0_50, %c0_51] : memref<8x32xf32, #tpu.memory_space<vmem>>, vector<8x32xf32>
    tpu.vector_store %arg8[%c0_50, %c0_51], %69 {strides = array<i32>} : memref<8x32xf32, #tpu.memory_space<vmem>>, vector<8x32xf32>,
    %c0_52 = arith.constant 0 : index
    %c0_53 = arith.constant 0 : index
    %73 = vector.load %arg7[%c0_52, %c0_53] : memref<8x32xf32, #tpu.memory_space<vmem>>, vector<8x32xf32>
    tpu.vector_store %arg7[%c0_52, %c0_53], %71 {strides = array<i32>} : memref<8x32xf32, #tpu.memory_space<vmem>>, vector<8x32xf32>,
    %c3_i32 = arith.constant 3 : i32
    %c8_i32_54 = arith.constant 8 : i32
    %74 = arith.muli %c3_i32, %c8_i32_54 : i32
    %75 = tpu.assume_multiple %74, 8 : i32
    %76 = arith.index_cast %75 : i32 to index
    %c0_55 = arith.constant 0 : index
    %77 = vector.load %arg9[%76, %c0_55] : memref<64x32xf32, #tpu.memory_space<vmem>>, vector<8x32xf32>
    %c0_56 = arith.constant 0 : index
    %c0_57 = arith.constant 0 : index
    %78 = vector.load %arg7[%c0_56, %c0_57] : memref<8x32xf32, #tpu.memory_space<vmem>>, vector<8x32xf32>
    %c0_58 = arith.constant 0 : index
    %c0_59 = arith.constant 0 : index
    %79 = vector.load %arg1[%c0_58, %c0_59] : memref<32x32xf32, #tpu.memory_space<vmem>>, vector<32x32xf32>
    %cst_60 = arith.constant dense<0.000000e+00> : vector<8x32xf32>
    %80 = tpu.matmul %78, %79, %cst_60 {dimension_numbers = #tpu.dot_dimension_numbers<[1], [0], [0], [1], [0, 0, 1, 1], [], []>} : vector<8x32xf32>, vector<32x32xf32>, vector<8x32xf32> -> vector<8x32xf32>
    %81 = arith.addf %80, %77 : vector<8x32xf32>
    %82 = arith.negf %81 : vector<8x32xf32>
    %83 = math.exp %82 : vector<8x32xf32>
    %cst_61 = arith.constant 1.000000e+00 : f32
    %84 = vector.broadcast %cst_61 : f32 to vector<8x32xf32>
    %85 = arith.addf %84, %83 : vector<8x32xf32>
    %86 = arith.divf %84, %85 : vector<8x32xf32>
    %87 = math.tanh %81 : vector<8x32xf32>
    %c0_62 = arith.constant 0 : index
    %c0_63 = arith.constant 0 : index
    %88 = vector.load %arg8[%c0_62, %c0_63] : memref<8x32xf32, #tpu.memory_space<vmem>>, vector<8x32xf32>
    %89 = arith.addf %88, %87 : vector<8x32xf32>
    %90 = arith.mulf %89, %86 : vector<8x32xf32>
    %91 = math.tanh %90 : vector<8x32xf32>
    %92 = arith.mulf %91, %86 : vector<8x32xf32>
    %c0_64 = arith.constant 0 : index
    %c0_65 = arith.constant 0 : index
    %93 = vector.load %arg8[%c0_64, %c0_65] : memref<8x32xf32, #tpu.memory_space<vmem>>, vector<8x32xf32>
    tpu.vector_store %arg8[%c0_64, %c0_65], %90 {strides = array<i32>} : memref<8x32xf32, #tpu.memory_space<vmem>>, vector<8x32xf32>,
    %c0_66 = arith.constant 0 : index
    %c0_67 = arith.constant 0 : index
    %94 = vector.load %arg7[%c0_66, %c0_67] : memref<8x32xf32, #tpu.memory_space<vmem>>, vector<8x32xf32>
    tpu.vector_store %arg7[%c0_66, %c0_67], %92 {strides = array<i32>} : memref<8x32xf32, #tpu.memory_space<vmem>>, vector<8x32xf32>,
    %c4_i32 = arith.constant 4 : i32
    %c8_i32_68 = arith.constant 8 : i32
    %95 = arith.muli %c4_i32, %c8_i32_68 : i32
    %96 = tpu.assume_multiple %95, 8 : i32
    %97 = arith.index_cast %96 : i32 to index
    %c0_69 = arith.constant 0 : index
    %98 = vector.load %arg9[%97, %c0_69] : memref<64x32xf32, #tpu.memory_space<vmem>>, vector<8x32xf32>
    %c0_70 = arith.constant 0 : index
    %c0_71 = arith.constant 0 : index
    %99 = vector.load %arg7[%c0_70, %c0_71] : memref<8x32xf32, #tpu.memory_space<vmem>>, vector<8x32xf32>
    %c0_72 = arith.constant 0 : index
    %c0_73 = arith.constant 0 : index
    %100 = vector.load %arg1[%c0_72, %c0_73] : memref<32x32xf32, #tpu.memory_space<vmem>>, vector<32x32xf32>
    %cst_74 = arith.constant dense<0.000000e+00> : vector<8x32xf32>
    %101 = tpu.matmul %99, %100, %cst_74 {dimension_numbers = #tpu.dot_dimension_numbers<[1], [0], [0], [1], [0, 0, 1, 1], [], []>} : vector<8x32xf32>, vector<32x32xf32>, vector<8x32xf32> -> vector<8x32xf32>
    %102 = arith.addf %101, %98 : vector<8x32xf32>
    %103 = arith.negf %102 : vector<8x32xf32>
    %104 = math.exp %103 : vector<8x32xf32>
    %cst_75 = arith.constant 1.000000e+00 : f32
    %105 = vector.broadcast %cst_75 : f32 to vector<8x32xf32>
    %106 = arith.addf %105, %104 : vector<8x32xf32>
    %107 = arith.divf %105, %106 : vector<8x32xf32>
    %108 = math.tanh %102 : vector<8x32xf32>
    %c0_76 = arith.constant 0 : index
    %c0_77 = arith.constant 0 : index
    %109 = vector.load %arg8[%c0_76, %c0_77] : memref<8x32xf32, #tpu.memory_space<vmem>>, vector<8x32xf32>
    %110 = arith.addf %109, %108 : vector<8x32xf32>
    %111 = arith.mulf %110, %107 : vector<8x32xf32>
    %112 = math.tanh %111 : vector<8x32xf32>
    %113 = arith.mulf %112, %107 : vector<8x32xf32>
    %c0_78 = arith.constant 0 : index
    %c0_79 = arith.constant 0 : index
    %114 = vector.load %arg8[%c0_78, %c0_79] : memref<8x32xf32, #tpu.memory_space<vmem>>, vector<8x32xf32>
    tpu.vector_store %arg8[%c0_78, %c0_79], %111 {strides = array<i32>} : memref<8x32xf32, #tpu.memory_space<vmem>>, vector<8x32xf32>,
    %c0_80 = arith.constant 0 : index
    %c0_81 = arith.constant 0 : index
    %115 = vector.load %arg7[%c0_80, %c0_81] : memref<8x32xf32, #tpu.memory_space<vmem>>, vector<8x32xf32>
    tpu.vector_store %arg7[%c0_80, %c0_81], %113 {strides = array<i32>} : memref<8x32xf32, #tpu.memory_space<vmem>>, vector<8x32xf32>,
    %c5_i32 = arith.constant 5 : i32
    %c8_i32_82 = arith.constant 8 : i32
    %116 = arith.muli %c5_i32, %c8_i32_82 : i32
    %117 = tpu.assume_multiple %116, 8 : i32
    %118 = arith.index_cast %117 : i32 to index
    %c0_83 = arith.constant 0 : index
    %119 = vector.load %arg9[%118, %c0_83] : memref<64x32xf32, #tpu.memory_space<vmem>>, vector<8x32xf32>
    %c0_84 = arith.constant 0 : index
    %c0_85 = arith.constant 0 : index
    %120 = vector.load %arg7[%c0_84, %c0_85] : memref<8x32xf32, #tpu.memory_space<vmem>>, vector<8x32xf32>
    %c0_86 = arith.constant 0 : index
    %c0_87 = arith.constant 0 : index
    %121 = vector.load %arg1[%c0_86, %c0_87] : memref<32x32xf32, #tpu.memory_space<vmem>>, vector<32x32xf32>
    %cst_88 = arith.constant dense<0.000000e+00> : vector<8x32xf32>
    %122 = tpu.matmul %120, %121, %cst_88 {dimension_numbers = #tpu.dot_dimension_numbers<[1], [0], [0], [1], [0, 0, 1, 1], [], []>} : vector<8x32xf32>, vector<32x32xf32>, vector<8x32xf32> -> vector<8x32xf32>
    %123 = arith.addf %122, %119 : vector<8x32xf32>
    %124 = arith.negf %123 : vector<8x32xf32>
    %125 = math.exp %124 : vector<8x32xf32>
    %cst_89 = arith.constant 1.000000e+00 : f32
    %126 = vector.broadcast %cst_89 : f32 to vector<8x32xf32>
    %127 = arith.addf %126, %125 : vector<8x32xf32>
    %128 = arith.divf %126, %127 : vector<8x32xf32>
    %129 = math.tanh %123 : vector<8x32xf32>
    %c0_90 = arith.constant 0 : index
    %c0_91 = arith.constant 0 : index
    %130 = vector.load %arg8[%c0_90, %c0_91] : memref<8x32xf32, #tpu.memory_space<vmem>>, vector<8x32xf32>
    %131 = arith.addf %130, %129 : vector<8x32xf32>
    %132 = arith.mulf %131, %128 : vector<8x32xf32>
    %133 = math.tanh %132 : vector<8x32xf32>
    %134 = arith.mulf %133, %128 : vector<8x32xf32>
    %c0_92 = arith.constant 0 : index
    %c0_93 = arith.constant 0 : index
    %135 = vector.load %arg8[%c0_92, %c0_93] : memref<8x32xf32, #tpu.memory_space<vmem>>, vector<8x32xf32>
    tpu.vector_store %arg8[%c0_92, %c0_93], %132 {strides = array<i32>} : memref<8x32xf32, #tpu.memory_space<vmem>>, vector<8x32xf32>,
    %c0_94 = arith.constant 0 : index
    %c0_95 = arith.constant 0 : index
    %136 = vector.load %arg7[%c0_94, %c0_95] : memref<8x32xf32, #tpu.memory_space<vmem>>, vector<8x32xf32>
    tpu.vector_store %arg7[%c0_94, %c0_95], %134 {strides = array<i32>} : memref<8x32xf32, #tpu.memory_space<vmem>>, vector<8x32xf32>,
    %c6_i32 = arith.constant 6 : i32
    %c8_i32_96 = arith.constant 8 : i32
    %137 = arith.muli %c6_i32, %c8_i32_96 : i32
    %138 = tpu.assume_multiple %137, 8 : i32
    %139 = arith.index_cast %138 : i32 to index
    %c0_97 = arith.constant 0 : index
    %140 = vector.load %arg9[%139, %c0_97] : memref<64x32xf32, #tpu.memory_space<vmem>>, vector<8x32xf32>
    %c0_98 = arith.constant 0 : index
    %c0_99 = arith.constant 0 : index
    %141 = vector.load %arg7[%c0_98, %c0_99] : memref<8x32xf32, #tpu.memory_space<vmem>>, vector<8x32xf32>
    %c0_100 = arith.constant 0 : index
    %c0_101 = arith.constant 0 : index
    %142 = vector.load %arg1[%c0_100, %c0_101] : memref<32x32xf32, #tpu.memory_space<vmem>>, vector<32x32xf32>
    %cst_102 = arith.constant dense<0.000000e+00> : vector<8x32xf32>
    %143 = tpu.matmul %141, %142, %cst_102 {dimension_numbers = #tpu.dot_dimension_numbers<[1], [0], [0], [1], [0, 0, 1, 1], [], []>} : vector<8x32xf32>, vector<32x32xf32>, vector<8x32xf32> -> vector<8x32xf32>
    %144 = arith.addf %143, %140 : vector<8x32xf32>
    %145 = arith.negf %144 : vector<8x32xf32>
    %146 = math.exp %145 : vector<8x32xf32>
    %cst_103 = arith.constant 1.000000e+00 : f32
    %147 = vector.broadcast %cst_103 : f32 to vector<8x32xf32>
    %148 = arith.addf %147, %146 : vector<8x32xf32>
    %149 = arith.divf %147, %148 : vector<8x32xf32>
    %150 = math.tanh %144 : vector<8x32xf32>
    %c0_104 = arith.constant 0 : index
    %c0_105 = arith.constant 0 : index
    %151 = vector.load %arg8[%c0_104, %c0_105] : memref<8x32xf32, #tpu.memory_space<vmem>>, vector<8x32xf32>
    %152 = arith.addf %151, %150 : vector<8x32xf32>
    %153 = arith.mulf %152, %149 : vector<8x32xf32>
    %154 = math.tanh %153 : vector<8x32xf32>
    %155 = arith.mulf %154, %149 : vector<8x32xf32>
    %c0_106 = arith.constant 0 : index
    %c0_107 = arith.constant 0 : index
    %156 = vector.load %arg8[%c0_106, %c0_107] : memref<8x32xf32, #tpu.memory_space<vmem>>, vector<8x32xf32>
    tpu.vector_store %arg8[%c0_106, %c0_107], %153 {strides = array<i32>} : memref<8x32xf32, #tpu.memory_space<vmem>>, vector<8x32xf32>,
    %c0_108 = arith.constant 0 : index
    %c0_109 = arith.constant 0 : index
    %157 = vector.load %arg7[%c0_108, %c0_109] : memref<8x32xf32, #tpu.memory_space<vmem>>, vector<8x32xf32>
    tpu.vector_store %arg7[%c0_108, %c0_109], %155 {strides = array<i32>} : memref<8x32xf32, #tpu.memory_space<vmem>>, vector<8x32xf32>,
    %c7_i32 = arith.constant 7 : i32
    %c8_i32_110 = arith.constant 8 : i32
    %158 = arith.muli %c7_i32, %c8_i32_110 : i32
    %159 = tpu.assume_multiple %158, 8 : i32
    %160 = arith.index_cast %159 : i32 to index
    %c0_111 = arith.constant 0 : index
    %161 = vector.load %arg9[%160, %c0_111] : memref<64x32xf32, #tpu.memory_space<vmem>>, vector<8x32xf32>
    %c0_112 = arith.constant 0 : index
    %c0_113 = arith.constant 0 : index
    %162 = vector.load %arg7[%c0_112, %c0_113] : memref<8x32xf32, #tpu.memory_space<vmem>>, vector<8x32xf32>
    %c0_114 = arith.constant 0 : index
    %c0_115 = arith.constant 0 : index
    %163 = vector.load %arg1[%c0_114, %c0_115] : memref<32x32xf32, #tpu.memory_space<vmem>>, vector<32x32xf32>
    %cst_116 = arith.constant dense<0.000000e+00> : vector<8x32xf32>
    %164 = tpu.matmul %162, %163, %cst_116 {dimension_numbers = #tpu.dot_dimension_numbers<[1], [0], [0], [1], [0, 0, 1, 1], [], []>} : vector<8x32xf32>, vector<32x32xf32>, vector<8x32xf32> -> vector<8x32xf32>
    %165 = arith.addf %164, %161 : vector<8x32xf32>
    %166 = arith.negf %165 : vector<8x32xf32>
    %167 = math.exp %166 : vector<8x32xf32>
    %cst_117 = arith.constant 1.000000e+00 : f32
    %168 = vector.broadcast %cst_117 : f32 to vector<8x32xf32>
    %169 = arith.addf %168, %167 : vector<8x32xf32>
    %170 = arith.divf %168, %169 : vector<8x32xf32>
    %171 = math.tanh %165 : vector<8x32xf32>
    %c0_118 = arith.constant 0 : index
    %c0_119 = arith.constant 0 : index
    %172 = vector.load %arg8[%c0_118, %c0_119] : memref<8x32xf32, #tpu.memory_space<vmem>>, vector<8x32xf32>
    %173 = arith.addf %172, %171 : vector<8x32xf32>
    %174 = arith.mulf %173, %170 : vector<8x32xf32>
    %175 = math.tanh %174 : vector<8x32xf32>
    %176 = arith.mulf %175, %170 : vector<8x32xf32>
    %c0_120 = arith.constant 0 : index
    %c0_121 = arith.constant 0 : index
    %177 = vector.load %arg8[%c0_120, %c0_121] : memref<8x32xf32, #tpu.memory_space<vmem>>, vector<8x32xf32>
    tpu.vector_store %arg8[%c0_120, %c0_121], %174 {strides = array<i32>} : memref<8x32xf32, #tpu.memory_space<vmem>>, vector<8x32xf32>,
    %c0_122 = arith.constant 0 : index
    %c0_123 = arith.constant 0 : index
    %178 = vector.load %arg7[%c0_122, %c0_123] : memref<8x32xf32, #tpu.memory_space<vmem>>, vector<8x32xf32>
    tpu.vector_store %arg7[%c0_122, %c0_123], %176 {strides = array<i32>} : memref<8x32xf32, #tpu.memory_space<vmem>>, vector<8x32xf32>,
    %c8_i32_124 = arith.constant 8 : i32
    %c0_i32_125 = arith.constant 0 : i32
    %c8_i32_126 = arith.constant 8 : i32
    %179 = arith.muli %c0_i32_125, %c8_i32_126 : i32
    %180 = tpu.assume_multiple %179, 8 : i32
    %181 = arith.index_cast %180 : i32 to index
    %c0_127 = arith.constant 0 : index
    %182 = vector.load %arg9[%181, %c0_127] : memref<64x32xf32, #tpu.memory_space<vmem>>, vector<8x32xf32>
    %c0_128 = arith.constant 0 : index
    %c0_129 = arith.constant 0 : index
    %183 = vector.load %arg7[%c0_128, %c0_129] : memref<8x32xf32, #tpu.memory_space<vmem>>, vector<8x32xf32>
    %c0_130 = arith.constant 0 : index
    %c0_131 = arith.constant 0 : index
    %184 = vector.load %arg1[%c0_130, %c0_131] : memref<32x32xf32, #tpu.memory_space<vmem>>, vector<32x32xf32>
    %cst_132 = arith.constant dense<0.000000e+00> : vector<8x32xf32>
    %185 = tpu.matmul %183, %184, %cst_132 {dimension_numbers = #tpu.dot_dimension_numbers<[1], [0], [0], [1], [0, 0, 1, 1], [], []>} : vector<8x32xf32>, vector<32x32xf32>, vector<8x32xf32> -> vector<8x32xf32>
    %186 = arith.addf %185, %182 : vector<8x32xf32>
    %187 = arith.negf %186 : vector<8x32xf32>
    %188 = math.exp %187 : vector<8x32xf32>
    %cst_133 = arith.constant 1.000000e+00 : f32
    %189 = vector.broadcast %cst_133 : f32 to vector<8x32xf32>
    %190 = arith.addf %189, %188 : vector<8x32xf32>
    %191 = arith.divf %189, %190 : vector<8x32xf32>
    %192 = math.tanh %186 : vector<8x32xf32>
    %c0_134 = arith.constant 0 : index
    %c0_135 = arith.constant 0 : index
    %193 = vector.load %arg8[%c0_134, %c0_135] : memref<8x32xf32, #tpu.memory_space<vmem>>, vector<8x32xf32>
    %194 = arith.addf %193, %192 : vector<8x32xf32>
    %195 = arith.mulf %194, %191 : vector<8x32xf32>
    %196 = math.tanh %195 : vector<8x32xf32>
    %197 = arith.mulf %196, %191 : vector<8x32xf32>
    %c0_136 = arith.constant 0 : index
    %c0_137 = arith.constant 0 : index
    %198 = vector.load %arg8[%c0_136, %c0_137] : memref<8x32xf32, #tpu.memory_space<vmem>>, vector<8x32xf32>
    tpu.vector_store %arg8[%c0_136, %c0_137], %195 {strides = array<i32>} : memref<8x32xf32, #tpu.memory_space<vmem>>, vector<8x32xf32>,
    %c0_138 = arith.constant 0 : index
    %c0_139 = arith.constant 0 : index
    %199 = vector.load %arg7[%c0_138, %c0_139] : memref<8x32xf32, #tpu.memory_space<vmem>>, vector<8x32xf32>
    tpu.vector_store %arg7[%c0_138, %c0_139], %197 {strides = array<i32>} : memref<8x32xf32, #tpu.memory_space<vmem>>, vector<8x32xf32>,
    %c1_i32_140 = arith.constant 1 : i32
    %c8_i32_141 = arith.constant 8 : i32
    %200 = arith.muli %c1_i32_140, %c8_i32_141 : i32
    %201 = tpu.assume_multiple %200, 8 : i32
    %202 = arith.index_cast %201 : i32 to index
    %c0_142 = arith.constant 0 : index
    %203 = vector.load %arg9[%202, %c0_142] : memref<64x32xf32, #tpu.memory_space<vmem>>, vector<8x32xf32>
    %c0_143 = arith.constant 0 : index
    %c0_144 = arith.constant 0 : index
    %204 = vector.load %arg7[%c0_143, %c0_144] : memref<8x32xf32, #tpu.memory_space<vmem>>, vector<8x32xf32>
    %c0_145 = arith.constant 0 : index
    %c0_146 = arith.constant 0 : index
    %205 = vector.load %arg1[%c0_145, %c0_146] : memref<32x32xf32, #tpu.memory_space<vmem>>, vector<32x32xf32>
    %cst_147 = arith.constant dense<0.000000e+00> : vector<8x32xf32>
    %206 = tpu.matmul %204, %205, %cst_147 {dimension_numbers = #tpu.dot_dimension_numbers<[1], [0], [0], [1], [0, 0, 1, 1], [], []>} : vector<8x32xf32>, vector<32x32xf32>, vector<8x32xf32> -> vector<8x32xf32>
    %207 = arith.addf %206, %203 : vector<8x32xf32>
    %208 = arith.negf %207 : vector<8x32xf32>
    %209 = math.exp %208 : vector<8x32xf32>
    %cst_148 = arith.constant 1.000000e+00 : f32
    %210 = vector.broadcast %cst_148 : f32 to vector<8x32xf32>
    %211 = arith.addf %210, %209 : vector<8x32xf32>
    %212 = arith.divf %210, %211 : vector<8x32xf32>
    %213 = math.tanh %207 : vector<8x32xf32>
    %c0_149 = arith.constant 0 : index
    %c0_150 = arith.constant 0 : index
    %214 = vector.load %arg8[%c0_149, %c0_150] : memref<8x32xf32, #tpu.memory_space<vmem>>, vector<8x32xf32>
    %215 = arith.addf %214, %213 : vector<8x32xf32>
    %216 = arith.mulf %215, %212 : vector<8x32xf32>
    %217 = math.tanh %216 : vector<8x32xf32>
    %218 = arith.mulf %217, %212 : vector<8x32xf32>
    %c0_151 = arith.constant 0 : index
    %c0_152 = arith.constant 0 : index
    %219 = vector.load %arg8[%c0_151, %c0_152] : memref<8x32xf32, #tpu.memory_space<vmem>>, vector<8x32xf32>
    tpu.vector_store %arg8[%c0_151, %c0_152], %216 {strides = array<i32>} : memref<8x32xf32, #tpu.memory_space<vmem>>, vector<8x32xf32>,
    %c0_153 = arith.constant 0 : index
    %c0_154 = arith.constant 0 : index
    %220 = vector.load %arg7[%c0_153, %c0_154] : memref<8x32xf32, #tpu.memory_space<vmem>>, vector<8x32xf32>
    tpu.vector_store %arg7[%c0_153, %c0_154], %218 {strides = array<i32>} : memref<8x32xf32, #tpu.memory_space<vmem>>, vector<8x32xf32>,
    %c2_i32_155 = arith.constant 2 : i32
    %c8_i32_156 = arith.constant 8 : i32
    %221 = arith.muli %c2_i32_155, %c8_i32_156 : i32
    %222 = tpu.assume_multiple %221, 8 : i32
    %223 = arith.index_cast %222 : i32 to index
    %c0_157 = arith.constant 0 : index
    %224 = vector.load %arg9[%223, %c0_157] : memref<64x32xf32, #tpu.memory_space<vmem>>, vector<8x32xf32>
    %c0_158 = arith.constant 0 : index
    %c0_159 = arith.constant 0 : index
    %225 = vector.load %arg7[%c0_158, %c0_159] : memref<8x32xf32, #tpu.memory_space<vmem>>, vector<8x32xf32>
    %c0_160 = arith.constant 0 : index
    %c0_161 = arith.constant 0 : index
    %226 = vector.load %arg1[%c0_160, %c0_161] : memref<32x32xf32, #tpu.memory_space<vmem>>, vector<32x32xf32>
    %cst_162 = arith.constant dense<0.000000e+00> : vector<8x32xf32>
    %227 = tpu.matmul %225, %226, %cst_162 {dimension_numbers = #tpu.dot_dimension_numbers<[1], [0], [0], [1], [0, 0, 1, 1], [], []>} : vector<8x32xf32>, vector<32x32xf32>, vector<8x32xf32> -> vector<8x32xf32>
    %228 = arith.addf %227, %224 : vector<8x32xf32>
    %229 = arith.negf %228 : vector<8x32xf32>
    %230 = math.exp %229 : vector<8x32xf32>
    %cst_163 = arith.constant 1.000000e+00 : f32
    %231 = vector.broadcast %cst_163 : f32 to vector<8x32xf32>
    %232 = arith.addf %231, %230 : vector<8x32xf32>
    %233 = arith.divf %231, %232 : vector<8x32xf32>
    %234 = math.tanh %228 : vector<8x32xf32>
    %c0_164 = arith.constant 0 : index
    %c0_165 = arith.constant 0 : index
    %235 = vector.load %arg8[%c0_164, %c0_165] : memref<8x32xf32, #tpu.memory_space<vmem>>, vector<8x32xf32>
    %236 = arith.addf %235, %234 : vector<8x32xf32>
    %237 = arith.mulf %236, %233 : vector<8x32xf32>
    %238 = math.tanh %237 : vector<8x32xf32>
    %239 = arith.mulf %238, %233 : vector<8x32xf32>
    %c0_166 = arith.constant 0 : index
    %c0_167 = arith.constant 0 : index
    %240 = vector.load %arg8[%c0_166, %c0_167] : memref<8x32xf32, #tpu.memory_space<vmem>>, vector<8x32xf32>
    tpu.vector_store %arg8[%c0_166, %c0_167], %237 {strides = array<i32>} : memref<8x32xf32, #tpu.memory_space<vmem>>, vector<8x32xf32>,
    %c0_168 = arith.constant 0 : index
    %c0_169 = arith.constant 0 : index
    %241 = vector.load %arg7[%c0_168, %c0_169] : memref<8x32xf32, #tpu.memory_space<vmem>>, vector<8x32xf32>
    tpu.vector_store %arg7[%c0_168, %c0_169], %239 {strides = array<i32>} : memref<8x32xf32, #tpu.memory_space<vmem>>, vector<8x32xf32>,
    %c3_i32_170 = arith.constant 3 : i32
    %c8_i32_171 = arith.constant 8 : i32
    %242 = arith.muli %c3_i32_170, %c8_i32_171 : i32
    %243 = tpu.assume_multiple %242, 8 : i32
    %244 = arith.index_cast %243 : i32 to index
    %c0_172 = arith.constant 0 : index
    %245 = vector.load %arg9[%244, %c0_172] : memref<64x32xf32, #tpu.memory_space<vmem>>, vector<8x32xf32>
    %c0_173 = arith.constant 0 : index
    %c0_174 = arith.constant 0 : index
    %246 = vector.load %arg7[%c0_173, %c0_174] : memref<8x32xf32, #tpu.memory_space<vmem>>, vector<8x32xf32>
    %c0_175 = arith.constant 0 : index
    %c0_176 = arith.constant 0 : index
    %247 = vector.load %arg1[%c0_175, %c0_176] : memref<32x32xf32, #tpu.memory_space<vmem>>, vector<32x32xf32>
    %cst_177 = arith.constant dense<0.000000e+00> : vector<8x32xf32>
    %248 = tpu.matmul %246, %247, %cst_177 {dimension_numbers = #tpu.dot_dimension_numbers<[1], [0], [0], [1], [0, 0, 1, 1], [], []>} : vector<8x32xf32>, vector<32x32xf32>, vector<8x32xf32> -> vector<8x32xf32>
    %249 = arith.addf %248, %245 : vector<8x32xf32>
    %250 = arith.negf %249 : vector<8x32xf32>
    %251 = math.exp %250 : vector<8x32xf32>
    %cst_178 = arith.constant 1.000000e+00 : f32
    %252 = vector.broadcast %cst_178 : f32 to vector<8x32xf32>
    %253 = arith.addf %252, %251 : vector<8x32xf32>
    %254 = arith.divf %252, %253 : vector<8x32xf32>
    %255 = math.tanh %249 : vector<8x32xf32>
    %c0_179 = arith.constant 0 : index
    %c0_180 = arith.constant 0 : index
    %256 = vector.load %arg8[%c0_179, %c0_180] : memref<8x32xf32, #tpu.memory_space<vmem>>, vector<8x32xf32>
    %257 = arith.addf %256, %255 : vector<8x32xf32>
    %258 = arith.mulf %257, %254 : vector<8x32xf32>
    %259 = math.tanh %258 : vector<8x32xf32>
    %260 = arith.mulf %259, %254 : vector<8x32xf32>
    %c0_181 = arith.constant 0 : index
    %c0_182 = arith.constant 0 : index
    %261 = vector.load %arg8[%c0_181, %c0_182] : memref<8x32xf32, #tpu.memory_space<vmem>>, vector<8x32xf32>
    tpu.vector_store %arg8[%c0_181, %c0_182], %258 {strides = array<i32>} : memref<8x32xf32, #tpu.memory_space<vmem>>, vector<8x32xf32>,
    %c0_183 = arith.constant 0 : index
    %c0_184 = arith.constant 0 : index
    %262 = vector.load %arg7[%c0_183, %c0_184] : memref<8x32xf32, #tpu.memory_space<vmem>>, vector<8x32xf32>
    tpu.vector_store %arg7[%c0_183, %c0_184], %260 {strides = array<i32>} : memref<8x32xf32, #tpu.memory_space<vmem>>, vector<8x32xf32>,
    %c4_i32_185 = arith.constant 4 : i32
    %c8_i32_186 = arith.constant 8 : i32
    %263 = arith.muli %c4_i32_185, %c8_i32_186 : i32
    %264 = tpu.assume_multiple %263, 8 : i32
    %265 = arith.index_cast %264 : i32 to index
    %c0_187 = arith.constant 0 : index
    %266 = vector.load %arg9[%265, %c0_187] : memref<64x32xf32, #tpu.memory_space<vmem>>, vector<8x32xf32>
    %c0_188 = arith.constant 0 : index
    %c0_189 = arith.constant 0 : index
    %267 = vector.load %arg7[%c0_188, %c0_189] : memref<8x32xf32, #tpu.memory_space<vmem>>, vector<8x32xf32>
    %c0_190 = arith.constant 0 : index
    %c0_191 = arith.constant 0 : index
    %268 = vector.load %arg1[%c0_190, %c0_191] : memref<32x32xf32, #tpu.memory_space<vmem>>, vector<32x32xf32>
    %cst_192 = arith.constant dense<0.000000e+00> : vector<8x32xf32>
    %269 = tpu.matmul %267, %268, %cst_192 {dimension_numbers = #tpu.dot_dimension_numbers<[1], [0], [0], [1], [0, 0, 1, 1], [], []>} : vector<8x32xf32>, vector<32x32xf32>, vector<8x32xf32> -> vector<8x32xf32>
    %270 = arith.addf %269, %266 : vector<8x32xf32>
    %271 = arith.negf %270 : vector<8x32xf32>
    %272 = math.exp %271 : vector<8x32xf32>
    %cst_193 = arith.constant 1.000000e+00 : f32
    %273 = vector.broadcast %cst_193 : f32 to vector<8x32xf32>
    %274 = arith.addf %273, %272 : vector<8x32xf32>
    %275 = arith.divf %273, %274 : vector<8x32xf32>
    %276 = math.tanh %270 : vector<8x32xf32>
    %c0_194 = arith.constant 0 : index
    %c0_195 = arith.constant 0 : index
    %277 = vector.load %arg8[%c0_194, %c0_195] : memref<8x32xf32, #tpu.memory_space<vmem>>, vector<8x32xf32>
    %278 = arith.addf %277, %276 : vector<8x32xf32>
    %279 = arith.mulf %278, %275 : vector<8x32xf32>
    %280 = math.tanh %279 : vector<8x32xf32>
    %281 = arith.mulf %280, %275 : vector<8x32xf32>
    %c0_196 = arith.constant 0 : index
    %c0_197 = arith.constant 0 : index
    %282 = vector.load %arg8[%c0_196, %c0_197] : memref<8x32xf32, #tpu.memory_space<vmem>>, vector<8x32xf32>
    tpu.vector_store %arg8[%c0_196, %c0_197], %279 {strides = array<i32>} : memref<8x32xf32, #tpu.memory_space<vmem>>, vector<8x32xf32>,
    %c0_198 = arith.constant 0 : index
    %c0_199 = arith.constant 0 : index
    %283 = vector.load %arg7[%c0_198, %c0_199] : memref<8x32xf32, #tpu.memory_space<vmem>>, vector<8x32xf32>
    tpu.vector_store %arg7[%c0_198, %c0_199], %281 {strides = array<i32>} : memref<8x32xf32, #tpu.memory_space<vmem>>, vector<8x32xf32>,
    %c5_i32_200 = arith.constant 5 : i32
    %c8_i32_201 = arith.constant 8 : i32
    %284 = arith.muli %c5_i32_200, %c8_i32_201 : i32
    %285 = tpu.assume_multiple %284, 8 : i32
    %286 = arith.index_cast %285 : i32 to index
    %c0_202 = arith.constant 0 : index
    %287 = vector.load %arg9[%286, %c0_202] : memref<64x32xf32, #tpu.memory_space<vmem>>, vector<8x32xf32>
    %c0_203 = arith.constant 0 : index
    %c0_204 = arith.constant 0 : index
    %288 = vector.load %arg7[%c0_203, %c0_204] : memref<8x32xf32, #tpu.memory_space<vmem>>, vector<8x32xf32>
    %c0_205 = arith.constant 0 : index
    %c0_206 = arith.constant 0 : index
    %289 = vector.load %arg1[%c0_205, %c0_206] : memref<32x32xf32, #tpu.memory_space<vmem>>, vector<32x32xf32>
    %cst_207 = arith.constant dense<0.000000e+00> : vector<8x32xf32>
    %290 = tpu.matmul %288, %289, %cst_207 {dimension_numbers = #tpu.dot_dimension_numbers<[1], [0], [0], [1], [0, 0, 1, 1], [], []>} : vector<8x32xf32>, vector<32x32xf32>, vector<8x32xf32> -> vector<8x32xf32>
    %291 = arith.addf %290, %287 : vector<8x32xf32>
    %292 = arith.negf %291 : vector<8x32xf32>
    %293 = math.exp %292 : vector<8x32xf32>
    %cst_208 = arith.constant 1.000000e+00 : f32
    %294 = vector.broadcast %cst_208 : f32 to vector<8x32xf32>
    %295 = arith.addf %294, %293 : vector<8x32xf32>
    %296 = arith.divf %294, %295 : vector<8x32xf32>
    %297 = math.tanh %291 : vector<8x32xf32>
    %c0_209 = arith.constant 0 : index
    %c0_210 = arith.constant 0 : index
    %298 = vector.load %arg8[%c0_209, %c0_210] : memref<8x32xf32, #tpu.memory_space<vmem>>, vector<8x32xf32>
    %299 = arith.addf %298, %297 : vector<8x32xf32>
    %300 = arith.mulf %299, %296 : vector<8x32xf32>
    %301 = math.tanh %300 : vector<8x32xf32>
    %302 = arith.mulf %301, %296 : vector<8x32xf32>
    %c0_211 = arith.constant 0 : index
    %c0_212 = arith.constant 0 : index
    %303 = vector.load %arg8[%c0_211, %c0_212] : memref<8x32xf32, #tpu.memory_space<vmem>>, vector<8x32xf32>
    tpu.vector_store %arg8[%c0_211, %c0_212], %300 {strides = array<i32>} : memref<8x32xf32, #tpu.memory_space<vmem>>, vector<8x32xf32>,
    %c0_213 = arith.constant 0 : index
    %c0_214 = arith.constant 0 : index
    %304 = vector.load %arg7[%c0_213, %c0_214] : memref<8x32xf32, #tpu.memory_space<vmem>>, vector<8x32xf32>
    tpu.vector_store %arg7[%c0_213, %c0_214], %302 {strides = array<i32>} : memref<8x32xf32, #tpu.memory_space<vmem>>, vector<8x32xf32>,
    %c6_i32_215 = arith.constant 6 : i32
    %c8_i32_216 = arith.constant 8 : i32
    %305 = arith.muli %c6_i32_215, %c8_i32_216 : i32
    %306 = tpu.assume_multiple %305, 8 : i32
    %307 = arith.index_cast %306 : i32 to index
    %c0_217 = arith.constant 0 : index
    %308 = vector.load %arg9[%307, %c0_217] : memref<64x32xf32, #tpu.memory_space<vmem>>, vector<8x32xf32>
    %c0_218 = arith.constant 0 : index
    %c0_219 = arith.constant 0 : index
    %309 = vector.load %arg7[%c0_218, %c0_219] : memref<8x32xf32, #tpu.memory_space<vmem>>, vector<8x32xf32>
    %c0_220 = arith.constant 0 : index
    %c0_221 = arith.constant 0 : index
    %310 = vector.load %arg1[%c0_220, %c0_221] : memref<32x32xf32, #tpu.memory_space<vmem>>, vector<32x32xf32>
    %cst_222 = arith.constant dense<0.000000e+00> : vector<8x32xf32>
    %311 = tpu.matmul %309, %310, %cst_222 {dimension_numbers = #tpu.dot_dimension_numbers<[1], [0], [0], [1], [0, 0, 1, 1], [], []>} : vector<8x32xf32>, vector<32x32xf32>, vector<8x32xf32> -> vector<8x32xf32>
    %312 = arith.addf %311, %308 : vector<8x32xf32>
    %313 = arith.negf %312 : vector<8x32xf32>
    %314 = math.exp %313 : vector<8x32xf32>
    %cst_223 = arith.constant 1.000000e+00 : f32
    %315 = vector.broadcast %cst_223 : f32 to vector<8x32xf32>
    %316 = arith.addf %315, %314 : vector<8x32xf32>
    %317 = arith.divf %315, %316 : vector<8x32xf32>
    %318 = math.tanh %312 : vector<8x32xf32>
    %c0_224 = arith.constant 0 : index
    %c0_225 = arith.constant 0 : index
    %319 = vector.load %arg8[%c0_224, %c0_225] : memref<8x32xf32, #tpu.memory_space<vmem>>, vector<8x32xf32>
    %320 = arith.addf %319, %318 : vector<8x32xf32>
    %321 = arith.mulf %320, %317 : vector<8x32xf32>
    %322 = math.tanh %321 : vector<8x32xf32>
    %323 = arith.mulf %322, %317 : vector<8x32xf32>
    %c0_226 = arith.constant 0 : index
    %c0_227 = arith.constant 0 : index
    %324 = vector.load %arg8[%c0_226, %c0_227] : memref<8x32xf32, #tpu.memory_space<vmem>>, vector<8x32xf32>
    tpu.vector_store %arg8[%c0_226, %c0_227], %321 {strides = array<i32>} : memref<8x32xf32, #tpu.memory_space<vmem>>, vector<8x32xf32>,
    %c0_228 = arith.constant 0 : index
    %c0_229 = arith.constant 0 : index
    %325 = vector.load %arg7[%c0_228, %c0_229] : memref<8x32xf32, #tpu.memory_space<vmem>>, vector<8x32xf32>
    tpu.vector_store %arg7[%c0_228, %c0_229], %323 {strides = array<i32>} : memref<8x32xf32, #tpu.memory_space<vmem>>, vector<8x32xf32>,
    %c7_i32_230 = arith.constant 7 : i32
    %c8_i32_231 = arith.constant 8 : i32
    %326 = arith.muli %c7_i32_230, %c8_i32_231 : i32
    %327 = tpu.assume_multiple %326, 8 : i32
    %328 = arith.index_cast %327 : i32 to index
    %c0_232 = arith.constant 0 : index
    %329 = vector.load %arg9[%328, %c0_232] : memref<64x32xf32, #tpu.memory_space<vmem>>, vector<8x32xf32>
    %c0_233 = arith.constant 0 : index
    %c0_234 = arith.constant 0 : index
    %330 = vector.load %arg7[%c0_233, %c0_234] : memref<8x32xf32, #tpu.memory_space<vmem>>, vector<8x32xf32>
    %c0_235 = arith.constant 0 : index
    %c0_236 = arith.constant 0 : index
    %331 = vector.load %arg1[%c0_235, %c0_236] : memref<32x32xf32, #tpu.memory_space<vmem>>, vector<32x32xf32>
    %cst_237 = arith.constant dense<0.000000e+00> : vector<8x32xf32>
    %332 = tpu.matmul %330, %331, %cst_237 {dimension_numbers = #tpu.dot_dimension_numbers<[1], [0], [0], [1], [0, 0, 1, 1], [], []>} : vector<8x32xf32>, vector<32x32xf32>, vector<8x32xf32> -> vector<8x32xf32>
    %333 = arith.addf %332, %329 : vector<8x32xf32>
    %334 = arith.negf %333 : vector<8x32xf32>
    %335 = math.exp %334 : vector<8x32xf32>
    %cst_238 = arith.constant 1.000000e+00 : f32
    %336 = vector.broadcast %cst_238 : f32 to vector<8x32xf32>
    %337 = arith.addf %336, %335 : vector<8x32xf32>
    %338 = arith.divf %336, %337 : vector<8x32xf32>
    %339 = math.tanh %333 : vector<8x32xf32>
    %c0_239 = arith.constant 0 : index
    %c0_240 = arith.constant 0 : index
    %340 = vector.load %arg8[%c0_239, %c0_240] : memref<8x32xf32, #tpu.memory_space<vmem>>, vector<8x32xf32>
    %341 = arith.addf %340, %339 : vector<8x32xf32>
    %342 = arith.mulf %341, %338 : vector<8x32xf32>
    %343 = math.tanh %342 : vector<8x32xf32>
    %344 = arith.mulf %343, %338 : vector<8x32xf32>
    %c0_241 = arith.constant 0 : index
    %c0_242 = arith.constant 0 : index
    %345 = vector.load %arg8[%c0_241, %c0_242] : memref<8x32xf32, #tpu.memory_space<vmem>>, vector<8x32xf32>
    tpu.vector_store %arg8[%c0_241, %c0_242], %342 {strides = array<i32>} : memref<8x32xf32, #tpu.memory_space<vmem>>, vector<8x32xf32>,
    %c0_243 = arith.constant 0 : index
    %c0_244 = arith.constant 0 : index
    %346 = vector.load %arg7[%c0_243, %c0_244] : memref<8x32xf32, #tpu.memory_space<vmem>>, vector<8x32xf32>
    tpu.vector_store %arg7[%c0_243, %c0_244], %344 {strides = array<i32>} : memref<8x32xf32, #tpu.memory_space<vmem>>, vector<8x32xf32>,
    %c8_i32_245 = arith.constant 8 : i32
    %c0_246 = arith.constant 0 : index
    %c0_247 = arith.constant 0 : index
    %347 = vector.load %arg7[%c0_246, %c0_247] : memref<8x32xf32, #tpu.memory_space<vmem>>, vector<8x32xf32>
    %c0_248 = arith.constant 0 : index
    %c0_249 = arith.constant 0 : index
    %348 = vector.load %arg4[%c0_248, %c0_249] : memref<32x16xf32, #tpu.memory_space<vmem>>, vector<32x16xf32>
    %cst_250 = arith.constant dense<0.000000e+00> : vector<8x16xf32>
    %349 = tpu.matmul %347, %348, %cst_250 {dimension_numbers = #tpu.dot_dimension_numbers<[1], [0], [0], [1], [0, 0, 1, 1], [], []>} : vector<8x32xf32>, vector<32x16xf32>, vector<8x16xf32> -> vector<8x16xf32>
    %c0_251 = arith.constant 0 : index
    %c0_252 = arith.constant 0 : index
    %350 = vector.load %arg5[%c0_251, %c0_252] : memref<1x16xf32, #tpu.memory_space<vmem>>, vector<1x16xf32>
    %351 = vector.broadcast %350 : vector<1x16xf32> to vector<8x16xf32>
    %352 = arith.addf %349, %351 : vector<8x16xf32>
    %c0_253 = arith.constant 0 : index
    %c0_254 = arith.constant 0 : index
    %353 = vector.load %arg6[%c0_253, %c0_254] : memref<8x16xf32, #tpu.memory_space<vmem>>, vector<8x16xf32>
    tpu.vector_store %arg6[%c0_253, %c0_254], %352 {strides = array<i32>} : memref<8x16xf32, #tpu.memory_space<vmem>>, vector<8x16xf32>,
    return
  }
}

</mosaic_0001>

<bundles_post_ra>
// kernel: tpu_custom_call.1
= control target key start
LH: loop header
LB: loop body
LE: loop exit
PB: predicated region body
PF: predicated region fallthrough
CT: control target
= control target key end

     0   :  { %vm41_vm0 = vcmask 130048   ;;  %vm171_vm1 = vcmask 261120   ;;  %v2271_v5 = vmov 0.0   ;;  %s2658_s0 = inlined_call_operand.vmem [shape: f32[64,16], index: 0, kind: input, shape index: {}]   ;;  %s2659_s1 = inlined_call_operand.vmem [shape: f32[32,32], index: 1, kind: input, shape index: {}]   ;;  %s2660_s2 = inlined_call_operand.vmem [shape: f32[16,32], index: 2, kind: input, shape index: {}]   ;;  %s2661_s3 = inlined_call_operand.vmem [shape: f32[1,32], index: 3, kind: input, shape index: {}]   ;;  %s2662_s4 = inlined_call_operand.vmem [shape: f32[32,16], index: 4, kind: input, shape index: {}]   ;;  %s2663_s5 = inlined_call_operand.vmem [shape: f32[1,16], index: 5, kind: input, shape index: {}]   ;;  %s2664_s6 = inlined_call_operand.hbm [shape: f32[8,16], index: 6, kind: output, shape index: {}]  }
   0x1   :  { %v33_v0 = vld [vmem:[%s2660_s2 + $0x8] sm:$0xff]  ;;  %v32_v1 = vld [vmem:[%s2660_s2] sm:$0xff]  ;;  %v2322_v3 = vld [vmem:[%s2659_s1 + $0x18] sm:$0xff]  ;;  %1931 = vmatprep.subr.mxu1 %v2271_v5  ;;  %180 = vst.msk [vmem:[#allocation2] sm:$0xff] %vm171_vm1, %v2271_v5 }
   0x2   :  { %v24_v2 = vld [vmem:[%s2658_s0] sm:$0xff]  ;;  %1915 = vmatprep.subr.mxu0 %v33_v0  ;;  %v25_v4 = vld [vmem:[%s2658_s0 + $0x8] sm:$0xff]  ;;  %v2331_v6 = vld [vmem:[%s2659_s1 + $0x10] sm:$0xff]  ;;  %181 = vst.msk [vmem:[#allocation3] sm:$0xff] %vm171_vm1, %v2271_v5 }
   0x3   :  { %1919 = vmatprep.mubr.msk.f32.mxu0 %vm41_vm0, %v24_v2  ;;  %1916 = vmatpush3.msra.mxu0 %v33_v0 }
   0x4   :  { %11 = vsyncpa [#allocation6], 0  ;;  %1917 = vmatprep.subr.mxu0 %v32_v1  ;;  %1932 = vmatpush3.msra.mxu1 %v2322_v3  ;;  %v2342_v7 = vld [vmem:[%s2659_s1 + $0x8] sm:$0xff]  ;;  %v2350_v8 = vld [vmem:[%s2659_s1] sm:$0xff]  ;;  %vm2272_vm2 = vmmov 0   ;;  %s2273_s7 = smov [#allocation5]  }
   0x5   :  { %1918 = vmatpush3.msra.mxu0 %v32_v1  ;;  %1933 = vmatprep.subr.mxu1 %v2271_v5  ;;  %v2381_v10 = vld [vmem:[%s2661_s3] ss:$0 sm:$0xff]  ;;  %v26_v30 = vld [vmem:[%s2658_s0 + $0x10] sm:$0xff]  ;;  %v27_v31 = vld [vmem:[%s2658_s0 + $0x18] sm:$0xff]  ;;  %s1769_s8 = sshll.u32 %s2273_s7, 4  ;;  %s1770_s8 = int_to_ptr.vmem [resolvable:$true] %s1769_s8 }
   0x6   :  { %1920 = vmatmul.mubr.msk.f32.vlgmr.msra.gmra.mxu0 %vm41_vm0, %v25_v4  ;;  %1934 = vmatpush3.msra.mxu1 %v2331_v6  ;;  %v28_v32 = vld [vmem:[%s2658_s0 + $0x20] sm:$0xff]  ;;  %v29_v33 = vld [vmem:[%s2658_s0 + $0x28] sm:$0xff]  ;;  %v30_v34 = vld [vmem:[%s2658_s0 + $0x30] sm:$0xff]  ;;  %s2249_s9 = scalar_lea.vmem %s1770_s8, 128  ;;  %p2254_p1 = scmp.lt.s32.totalorder %s1770_s8, %s1770_s8 }
   0x7   :  { %1935 = vmatprep.subr.mxu1 %v2271_v5  ;;  %1939 = vmatprep.mubr.msk.f32.mxu1 %vm2272_vm2, %v2271_v5  ;;  %v31_v35 = vld [vmem:[%s2658_s0 + $0x38] sm:$0xff]  ;;  %p2250_p0 = scmp.ne.s32.totalorder %s1770_s8, %s2249_s9  ;;  %p2255_p2 = scmp.lt.s32.totalorder %s2249_s9, %s2249_s9 }
   0x8   :  { %1936 = vmatpush3.msra.mxu1 %v2342_v7  ;;  %1953 = vmatprep.subr.mxu0 %v2271_v5  ;;  %v183_v9 = vld [vmem:[#allocation2] sm:$0xff] }
   0x9   :  { %1937 = vmatprep.subr.mxu1 %v2271_v5  ;;  %1954 = vmatpush3.msra.mxu0 %v2322_v3  ;;  %v268_v23 = vld [vmem:[#allocation3] sm:$0xff]  ;;  %p2256_p3 = por %p2255_p2, %p2254_p1 }
   0xa   :  { %1938 = vmatpush3.msra.mxu1 %v2350_v8  ;;  %1955 = vmatprep.subr.mxu0 %v2271_v5 }
   0xb   :  { %1940 = vmatmul.mubr.msk.f32.vlgmr.msra.gmra.mxu1 %vm171_vm1, %v183_v9  ;;  %1942 = vmatprep.subr.mxu1 %v2271_v5  ;;  %p2257_p4 = pnand %p2256_p3, %p2250_p0 }
   0xc   :  { %1943 = vmatpush3.msra.mxu1 %v2322_v3  ;;  %1950 = vmatprep.mubr.msk.f32.mxu1 %vm2272_vm2, %v2271_v5 }
   0xd   :  { %1944 = vmatprep.subr.mxu1 %v2271_v5  ;;  %1956 = vmatpush3.msra.mxu0 %v2331_v6 }
   0xe   :  { %1945 = vmatpush3.msra.mxu1 %v2331_v6  ;;  %1957 = vmatprep.subr.mxu0 %v2271_v5 }
   0xf   :  { %1946 = vmatprep.subr.mxu1 %v2271_v5  ;;  %1958 = vmatpush3.msra.mxu0 %v2342_v7 }
  0x10   :  { %1947 = vmatpush3.msra.mxu1 %v2342_v7  ;;  %1959 = vmatprep.subr.mxu0 %v2271_v5 }
  0x11   :  { %1948 = vmatprep.subr.mxu1 %v2271_v5  ;;  %1960 = vmatpush3.msra.mxu0 %v2350_v8 }
  0x12   :  { %1949 = vmatpush3.msra.mxu1 %v2350_v8  ;;  %1975 = vmatprep.subr.mxu0 %v2271_v5 }
  0x13   :  { %1964 = vmatprep.subr.mxu1 %v2271_v5  ;;  %1922 = vmatprep.mubr.msk.f32.mxu0 %vm41_vm0, %v26_v30 }
  0x14   :  { %1923 = vmatmul.mubr.msk.f32.gmra.mxu0 %vm41_vm0, %v27_v31 }
  0x15   :  { %1925 = vmatprep.mubr.msk.f32.mxu0 %vm41_vm0, %v28_v32 }
  0x18   :  { %1926 = vmatmul.mubr.msk.f32.gmra.mxu0 %vm41_vm0, %v29_v33 }
  0x19   :  { %1928 = vmatprep.mubr.msk.f32.mxu0 %vm41_vm0, %v30_v34 }
  0x1c   :  { %1929 = vmatmul.mubr.msk.f32.gmra.mxu0 %vm41_vm0, %v31_v35 }
  0x1d   :  { %1961 = vmatprep.mubr.msk.f32.mxu0 %vm2272_vm2, %v2271_v5 }
  0xc6   :  { %v1921_v11 = vpop.f32.mrf.mxu0 }
  0xc7   :  { %v138_v12 = vadd.f32 %v1921_v11, %v2381_v10 }
  0xc8   :  { %v132_v13 = vpop.f32.mrf.mxu0 }
  0xc9   :  { %173 = vst.msk [vmem:[#allocation4 + $0x8] sm:$0xff] %vm171_vm1, %v138_v12  ;;  %v133_v14 = vadd.f32 %v2381_v10, %v132_v13 }
  0xcb   :  { %172 = vst.msk [vmem:[#allocation4] sm:$0xff] %vm171_vm1, %v133_v14  ;;  %v257_v15 = vpop.f32.mrf.mxu1 }
  0xcd   :  { %v1941_v16 = vpop.f32.mrf.mxu1 }
  0xd0   :  { %v2429_v36 = vld [vmem:[#allocation4 + $0x8] sm:$0xff] }
  0xd2   :  { %v2387_v17 = vld [vmem:[#allocation4] sm:$0xff] }
  0xd3   :  { %v258_v18 = vadd.f32 %v257_v15, %v2387_v17 }
  0xd4   :  { %v1924_v51 = vpop.f32.mrf.mxu0 }
  0xd5   :  { %v1787_v19 = vmul.f32 -1.442695, %v258_v18  ;;  %v148_v52 = vadd.f32 %v1924_v51, %v2381_v10 }
  0xd6   :  { %v142_v53 = vpop.f32.mrf.mxu0 }
  0xd7   :  { %2121 = vpow2.f32 %v1787_v19  ;;  %175 = vst.msk [vmem:[#allocation4 + $0x18] sm:$0xff] %vm171_vm1, %v148_v52  ;;  %v143_v54 = vadd.f32 %v2381_v10, %v142_v53 }
  0xd8   :  { %2123 = vtanh.f32 %v258_v18  ;;  %v1927_v55 = vpop.f32.mrf.mxu0 }
  0xd9   :  { %174 = vst.msk [vmem:[#allocation4 + $0x10] sm:$0xff] %vm171_vm1, %v143_v54  ;;  %v158_v56 = vadd.f32 %v1927_v55, %v2381_v10 }
  0xda   :  { %v152_v57 = vpop.f32.mrf.mxu0 }
  0xdb   :  { %177 = vst.msk [vmem:[#allocation4 + $0x28] sm:$0xff] %vm171_vm1, %v158_v56  ;;  %v153_v58 = vadd.f32 %v2381_v10, %v152_v57 }
  0xdc   :  { %v1930_v59 = vpop.f32.mrf.mxu0 }
  0xdd   :  { %176 = vst.msk [vmem:[#allocation4 + $0x20] sm:$0xff] %vm171_vm1, %v153_v58  ;;  %v168_v60 = vadd.f32 %v1930_v59, %v2381_v10 }
  0xde   :  { %v162_v61 = vpop.f32.mrf.mxu0 }
  0xdf   :  { %179 = vst.msk [vmem:[#allocation4 + $0x38] sm:$0xff] %vm171_vm1, %v168_v60  ;;  %v163_v62 = vadd.f32 %v2381_v10, %v162_v61 }
  0xe0   :  { %v2457_v63 = vld [vmem:[#allocation4 + $0x10] sm:$0xff] }
  0xe1   :  { %178 = vst.msk [vmem:[#allocation4 + $0x30] sm:$0xff] %vm171_vm1, %v163_v62 }
  0xe2   :  { %v2505_v51 = vld [vmem:[#allocation4 + $0x28] sm:$0xff] }
  0xe4   :  { %v2122_v20 = vpop.eup %2121  ;;  %v2489_v35 = vld [vmem:[#allocation4 + $0x20] sm:$0xff] }
  0xe5   :  { %v264_v21 = vadd.f32 1.0, %v2122_v20  ;;  %v2124_v22 = vpop.eup %2123  ;;  %v2473_v20 = vld [vmem:[#allocation4 + $0x18] sm:$0xff] }
  0xe6   :  { %v269_v24 = vadd.f32 %v2124_v22, %v268_v23 }
  0xe7   :  { %2125 = vrcp.f32 %v264_v21 }
  0xf4   :  { %v2126_v25 = vpop.eup %2125 }
  0xf5   :  { %v270_v26 = vmul.f32 %v2126_v25, %v269_v24 }
  0xf7   :  { %2127 = vtanh.f32 %v270_v26  ;;  %273 = vst.msk [vmem:[#allocation3] sm:$0xff] %vm171_vm1, %v270_v26 }
  0xfe   :  { %v362_v44 = vld [vmem:[#allocation3] sm:$0xff] }
 0x104   :  { %v2128_v27 = vpop.eup %2127 }
 0x105   :  { %v272_v28 = vmul.f32 %v2128_v27, %v2126_v25 }
 0x107   :  { %274 = vst.msk [vmem:[#allocation2] sm:$0xff] %vm171_vm1, %v272_v28 }
 0x10e   :  { %v277_v29 = vld [vmem:[#allocation2] sm:$0xff] }
 0x10f   :  { %1951 = vmatmul.mubr.msk.f32.vlgmr.msra.gmra.mxu1 %vm171_vm1, %v277_v29 }
 0x110   :  { %1965 = vmatpush3.msra.mxu1 %v2322_v3  ;;  %1972 = vmatprep.mubr.msk.f32.mxu1 %vm2272_vm2, %v2271_v5 }
 0x111   :  { %1966 = vmatprep.subr.mxu1 %v2271_v5 }
 0x112   :  { %1967 = vmatpush3.msra.mxu1 %v2331_v6 }
 0x113   :  { %1968 = vmatprep.subr.mxu1 %v2271_v5 }
 0x114   :  { %1969 = vmatpush3.msra.mxu1 %v2342_v7 }
 0x115   :  { %1970 = vmatprep.subr.mxu1 %v2271_v5 }
 0x116   :  { %1971 = vmatpush3.msra.mxu1 %v2350_v8 }
 0x117   :  { %1986 = vmatprep.subr.mxu1 %v2271_v5 }
 0x1cf   :  { %v351_v37 = vpop.f32.mrf.mxu1 }
 0x1d0   :  { %v352_v38 = vadd.f32 %v351_v37, %v2429_v36 }
 0x1d1   :  { %v1952_v39 = vpop.f32.mrf.mxu1 }
 0x1d2   :  { %v1789_v40 = vmul.f32 -1.442695, %v352_v38 }
 0x1d4   :  { %2129 = vpow2.f32 %v1789_v40 }
 0x1d5   :  { %2131 = vtanh.f32 %v352_v38 }
 0x1e1   :  { %v2130_v41 = vpop.eup %2129 }
 0x1e2   :  { %v358_v42 = vadd.f32 1.0, %v2130_v41  ;;  %v2132_v43 = vpop.eup %2131 }
 0x1e3   :  { %v363_v45 = vadd.f32 %v2132_v43, %v362_v44 }
 0x1e4   :  { %2133 = vrcp.f32 %v358_v42 }
 0x1f1   :  { %v2134_v46 = vpop.eup %2133 }
 0x1f2   :  { %v364_v47 = vmul.f32 %v2134_v46, %v363_v45 }
 0x1f4   :  { %2135 = vtanh.f32 %v364_v47  ;;  %367 = vst.msk [vmem:[#allocation3] sm:$0xff] %vm171_vm1, %v364_v47 }
 0x1fb   :  { %v456_v13 = vld [vmem:[#allocation3] sm:$0xff] }
 0x201   :  { %v2136_v48 = vpop.eup %2135 }
 0x202   :  { %v366_v49 = vmul.f32 %v2136_v48, %v2134_v46 }
 0x204   :  { %368 = vst.msk [vmem:[#allocation2] sm:$0xff] %vm171_vm1, %v366_v49 }
 0x20b   :  { %v371_v50 = vld [vmem:[#allocation2] sm:$0xff] }
 0x20c   :  { %1962 = vmatmul.mubr.msk.f32.vlgmr.msra.gmra.mxu0 %vm171_vm1, %v371_v50 }
 0x20d   :  { %1976 = vmatpush3.msra.mxu0 %v2322_v3  ;;  %1983 = vmatprep.mubr.msk.f32.mxu0 %vm2272_vm2, %v2271_v5 }
 0x20e   :  { %1977 = vmatprep.subr.mxu0 %v2271_v5 }
 0x20f   :  { %1978 = vmatpush3.msra.mxu0 %v2331_v6 }
 0x210   :  { %1979 = vmatprep.subr.mxu0 %v2271_v5 }
 0x211   :  { %1980 = vmatpush3.msra.mxu0 %v2342_v7 }
 0x212   :  { %1981 = vmatprep.subr.mxu0 %v2271_v5 }
 0x213   :  { %1982 = vmatpush3.msra.mxu0 %v2350_v8 }
 0x214   :  { %1997 = vmatprep.subr.mxu0 %v2271_v5 }
 0x2cc   :  { %v445_v0 = vpop.f32.mrf.mxu0 }
 0x2cd   :  { %v446_v1 = vadd.f32 %v445_v0, %v2457_v63 }
 0x2ce   :  { %v1963_v2 = vpop.f32.mrf.mxu0 }
 0x2cf   :  { %v1791_v4 = vmul.f32 -1.442695, %v446_v1 }
 0x2d1   :  { %2137 = vpow2.f32 %v1791_v4  ;;  %v2521_v4 = vld [vmem:[#allocation4 + $0x30] sm:$0xff] }
 0x2d2   :  { %2139 = vtanh.f32 %v446_v1 }
 0x2de   :  { %v2138_v9 = vpop.eup %2137 }
 0x2df   :  { %v452_v11 = vadd.f32 1.0, %v2138_v9  ;;  %v2140_v12 = vpop.eup %2139 }
 0x2e0   :  { %v457_v14 = vadd.f32 %v2140_v12, %v456_v13 }
 0x2e1   :  { %2141 = vrcp.f32 %v452_v11 }
 0x2ee   :  { %v2142_v15 = vpop.eup %2141 }
 0x2ef   :  { %v458_v16 = vmul.f32 %v2142_v15, %v457_v14 }
 0x2f1   :  { %2143 = vtanh.f32 %v458_v16  ;;  %461 = vst.msk [vmem:[#allocation3] sm:$0xff] %vm171_vm1, %v458_v16 }
 0x2f8   :  { %v550_v28 = vld [vmem:[#allocation3] sm:$0xff] }
 0x2fe   :  { %v2144_v10 = vpop.eup %2143 }
 0x2ff   :  { %v460_v18 = vmul.f32 %v2144_v10, %v2142_v15 }
 0x301   :  { %462 = vst.msk [vmem:[#allocation2] sm:$0xff] %vm171_vm1, %v460_v18 }
 0x308   :  { %v465_v19 = vld [vmem:[#allocation2] sm:$0xff] }
 0x309   :  { %1973 = vmatmul.mubr.msk.f32.vlgmr.msra.gmra.mxu1 %vm171_vm1, %v465_v19 }
 0x30a   :  { %1987 = vmatpush3.msra.mxu1 %v2322_v3  ;;  %1994 = vmatprep.mubr.msk.f32.mxu1 %vm2272_vm2, %v2271_v5 }
 0x30b   :  { %1988 = vmatprep.subr.mxu1 %v2271_v5 }
 0x30c   :  { %1989 = vmatpush3.msra.mxu1 %v2331_v6 }
 0x30d   :  { %1990 = vmatprep.subr.mxu1 %v2271_v5 }
 0x30e   :  { %1991 = vmatpush3.msra.mxu1 %v2342_v7 }
 0x30f   :  { %1992 = vmatprep.subr.mxu1 %v2271_v5 }
 0x310   :  { %1993 = vmatpush3.msra.mxu1 %v2350_v8 }
 0x311   :  { %2008 = vmatprep.subr.mxu1 %v2271_v5 }
 0x3c9   :  { %v539_v21 = vpop.f32.mrf.mxu1 }
 0x3ca   :  { %v540_v22 = vadd.f32 %v539_v21, %v2473_v20 }
 0x3cb   :  { %v1974_v23 = vpop.f32.mrf.mxu1 }
 0x3cc   :  { %v1793_v24 = vmul.f32 -1.442695, %v540_v22 }
 0x3ce   :  { %2145 = vpow2.f32 %v1793_v24 }
 0x3cf   :  { %2147 = vtanh.f32 %v540_v22 }
 0x3db   :  { %v2146_v25 = vpop.eup %2145 }
 0x3dc   :  { %v546_v26 = vadd.f32 1.0, %v2146_v25  ;;  %v2148_v27 = vpop.eup %2147  ;;  %v2537_v25 = vld [vmem:[#allocation4 + $0x38] sm:$0xff] }
 0x3dd   :  { %v551_v29 = vadd.f32 %v2148_v27, %v550_v28 }
 0x3de   :  { %2149 = vrcp.f32 %v546_v26 }
 0x3eb   :  { %v2150_v30 = vpop.eup %2149 }
 0x3ec   :  { %v552_v31 = vmul.f32 %v2150_v30, %v551_v29 }
 0x3ee   :  { %2151 = vtanh.f32 %v552_v31  ;;  %555 = vst.msk [vmem:[#allocation3] sm:$0xff] %vm171_vm1, %v552_v31 }
 0x3f5   :  { %v644_v44 = vld [vmem:[#allocation3] sm:$0xff] }
 0x3fb   :  { %v2152_v32 = vpop.eup %2151 }
 0x3fc   :  { %v554_v33 = vmul.f32 %v2152_v32, %v2150_v30 }
 0x3fe   :  { %556 = vst.msk [vmem:[#allocation2] sm:$0xff] %vm171_vm1, %v554_v33 }
 0x405   :  { %v559_v34 = vld [vmem:[#allocation2] sm:$0xff] }
 0x406   :  { %1984 = vmatmul.mubr.msk.f32.vlgmr.msra.gmra.mxu0 %vm171_vm1, %v559_v34 }
 0x407   :  { %1998 = vmatpush3.msra.mxu0 %v2322_v3  ;;  %2005 = vmatprep.mubr.msk.f32.mxu0 %vm2272_vm2, %v2271_v5 }
 0x408   :  { %1999 = vmatprep.subr.mxu0 %v2271_v5 }
 0x409   :  { %2000 = vmatpush3.msra.mxu0 %v2331_v6 }
 0x40a   :  { %2001 = vmatprep.subr.mxu0 %v2271_v5 }
 0x40b   :  { %2002 = vmatpush3.msra.mxu0 %v2342_v7 }
 0x40c   :  { %2003 = vmatprep.subr.mxu0 %v2271_v5 }
 0x40d   :  { %2004 = vmatpush3.msra.mxu0 %v2350_v8 }
 0x40e   :  { %2019 = vmatprep.subr.mxu0 %v2271_v5 }
 0x4c6   :  { %v633_v37 = vpop.f32.mrf.mxu0 }
 0x4c7   :  { %v634_v38 = vadd.f32 %v633_v37, %v2489_v35 }
 0x4c8   :  { %v1985_v39 = vpop.f32.mrf.mxu0 }
 0x4c9   :  { %v1795_v40 = vmul.f32 -1.442695, %v634_v38 }
 0x4cb   :  { %2153 = vpow2.f32 %v1795_v40 }
 0x4cc   :  { %2155 = vtanh.f32 %v634_v38 }
 0x4d8   :  { %v2154_v41 = vpop.eup %2153 }
 0x4d9   :  { %v640_v42 = vadd.f32 1.0, %v2154_v41  ;;  %v2156_v43 = vpop.eup %2155 }
 0x4da   :  { %v645_v45 = vadd.f32 %v2156_v43, %v644_v44 }
 0x4db   :  { %2157 = vrcp.f32 %v640_v42 }
 0x4e8   :  { %v2158_v46 = vpop.eup %2157 }
 0x4e9   :  { %v646_v47 = vmul.f32 %v2158_v46, %v645_v45 }
 0x4eb   :  { %2159 = vtanh.f32 %v646_v47  ;;  %649 = vst.msk [vmem:[#allocation3] sm:$0xff] %vm171_vm1, %v646_v47 }
 0x4f2   :  { %v738_v59 = vld [vmem:[#allocation3] sm:$0xff] }
 0x4f8   :  { %v2160_v48 = vpop.eup %2159 }
 0x4f9   :  { %v648_v49 = vmul.f32 %v2160_v48, %v2158_v46 }
 0x4fb   :  { %650 = vst.msk [vmem:[#allocation2] sm:$0xff] %vm171_vm1, %v648_v49 }
 0x502   :  { %v653_v50 = vld [vmem:[#allocation2] sm:$0xff] }
 0x503   :  { %1995 = vmatmul.mubr.msk.f32.vlgmr.msra.gmra.mxu1 %vm171_vm1, %v653_v50 }
 0x504   :  { %2009 = vmatpush3.msra.mxu1 %v2322_v3  ;;  %2016 = vmatprep.mubr.msk.f32.mxu1 %vm2272_vm2, %v2271_v5 }
 0x505   :  { %2010 = vmatprep.subr.mxu1 %v2271_v5 }
 0x506   :  { %2011 = vmatpush3.msra.mxu1 %v2331_v6 }
 0x507   :  { %2012 = vmatprep.subr.mxu1 %v2271_v5 }
 0x508   :  { %2013 = vmatpush3.msra.mxu1 %v2342_v7 }
 0x509   :  { %2014 = vmatprep.subr.mxu1 %v2271_v5 }
 0x50a   :  { %2015 = vmatpush3.msra.mxu1 %v2350_v8 }
 0x50b   :  { %2030 = vmatprep.subr.mxu1 %v2271_v5 }
 0x5c3   :  { %v727_v52 = vpop.f32.mrf.mxu1 }
 0x5c4   :  { %v728_v53 = vadd.f32 %v727_v52, %v2505_v51 }
 0x5c5   :  { %v1996_v54 = vpop.f32.mrf.mxu1 }
 0x5c6   :  { %v1797_v55 = vmul.f32 -1.442695, %v728_v53 }
 0x5c8   :  { %2161 = vpow2.f32 %v1797_v55 }
 0x5c9   :  { %2163 = vtanh.f32 %v728_v53 }
 0x5d5   :  { %v2162_v56 = vpop.eup %2161 }
 0x5d6   :  { %v734_v57 = vadd.f32 1.0, %v2162_v56  ;;  %v2164_v58 = vpop.eup %2163 }
 0x5d7   :  { %v739_v60 = vadd.f32 %v2164_v58, %v738_v59 }
 0x5d8   :  { %2165 = vrcp.f32 %v734_v57 }
 0x5e5   :  { %v2166_v61 = vpop.eup %2165 }
 0x5e6   :  { %v740_v62 = vmul.f32 %v2166_v61, %v739_v60 }
 0x5e8   :  { %2167 = vtanh.f32 %v740_v62  ;;  %743 = vst.msk [vmem:[#allocation3] sm:$0xff] %vm171_vm1, %v740_v62 }
 0x5ef   :  { %v832_v10 = vld [vmem:[#allocation3] sm:$0xff] }
 0x5f5   :  { %v2168_v0 = vpop.eup %2167 }
 0x5f6   :  { %v742_v1 = vmul.f32 %v2168_v0, %v2166_v61 }
 0x5f8   :  { %744 = vst.msk [vmem:[#allocation2] sm:$0xff] %vm171_vm1, %v742_v1 }
 0x5ff   :  { %v747_v2 = vld [vmem:[#allocation2] sm:$0xff] }
 0x600   :  { %2006 = vmatmul.mubr.msk.f32.vlgmr.msra.gmra.mxu0 %vm171_vm1, %v747_v2 }
 0x601   :  { %2020 = vmatpush3.msra.mxu0 %v2322_v3  ;;  %2027 = vmatprep.mubr.msk.f32.mxu0 %vm2272_vm2, %v2271_v5 }
 0x602   :  { %2021 = vmatprep.subr.mxu0 %v2271_v5 }
 0x603   :  { %2022 = vmatpush3.msra.mxu0 %v2331_v6 }
 0x604   :  { %2023 = vmatprep.subr.mxu0 %v2271_v5 }
 0x605   :  { %2024 = vmatpush3.msra.mxu0 %v2342_v7 }
 0x606   :  { %2025 = vmatprep.subr.mxu0 %v2271_v5 }
 0x607   :  { %2026 = vmatpush3.msra.mxu0 %v2350_v8 }
 0x608   :  { %2041 = vmatprep.subr.mxu0 %v2271_v5 }
 0x6c0   :  { %v821_v9 = vpop.f32.mrf.mxu0 }
 0x6c1   :  { %v822_v11 = vadd.f32 %v821_v9, %v2521_v4 }
 0x6c2   :  { %v2007_v12 = vpop.f32.mrf.mxu0 }
 0x6c3   :  { %v1799_v13 = vmul.f32 -1.442695, %v822_v11 }
 0x6c5   :  { %2169 = vpow2.f32 %v1799_v13 }
 0x6c6   :  { %2171 = vtanh.f32 %v822_v11 }
 0x6d2   :  { %v2170_v14 = vpop.eup %2169 }
 0x6d3   :  { %v828_v15 = vadd.f32 1.0, %v2170_v14  ;;  %v2172_v16 = vpop.eup %2171 }
 0x6d4   :  { %v833_v18 = vadd.f32 %v2172_v16, %v832_v10 }
 0x6d5   :  { %2173 = vrcp.f32 %v828_v15 }
 0x6e2   :  { %v2174_v19 = vpop.eup %2173 }
 0x6e3   :  { %v834_v21 = vmul.f32 %v2174_v19, %v833_v18 }
 0x6e5   :  { %2175 = vtanh.f32 %v834_v21  ;;  %837 = vst.msk [vmem:[#allocation3] sm:$0xff] %vm171_vm1, %v834_v21 }
 0x6ec   :  { %v926_v33 = vld [vmem:[#allocation3] sm:$0xff] }
 0x6f2   :  { %v2176_v22 = vpop.eup %2175 }
 0x6f3   :  { %v836_v23 = vmul.f32 %v2176_v22, %v2174_v19 }
 0x6f5   :  { %838 = vst.msk [vmem:[#allocation2] sm:$0xff] %vm171_vm1, %v836_v23 }
 0x6fc   :  { %v841_v24 = vld [vmem:[#allocation2] sm:$0xff] }
 0x6fd   :  { %2017 = vmatmul.mubr.msk.f32.vlgmr.msra.gmra.mxu1 %vm171_vm1, %v841_v24 }
 0x6fe   :  { %2031 = vmatpush3.msra.mxu1 %v2322_v3  ;;  %2038 = vmatprep.mubr.msk.f32.mxu1 %vm2272_vm2, %v2271_v5 }
 0x6ff   :  { %2032 = vmatprep.subr.mxu1 %v2271_v5 }
 0x700   :  { %2033 = vmatpush3.msra.mxu1 %v2331_v6 }
 0x701   :  { %2034 = vmatprep.subr.mxu1 %v2271_v5 }
 0x702   :  { %2035 = vmatpush3.msra.mxu1 %v2342_v7 }
 0x703   :  { %2036 = vmatprep.subr.mxu1 %v2271_v5 }
 0x704   :  { %2037 = vmatpush3.msra.mxu1 %v2350_v8 }
 0x705   :  { %2052 = vmatprep.subr.mxu1 %v2271_v5 }
 0x7bd   :  { %v915_v26 = vpop.f32.mrf.mxu1 }
 0x7be   :  { %v916_v27 = vadd.f32 %v915_v26, %v2537_v25 }
 0x7bf   :  { %v2018_v28 = vpop.f32.mrf.mxu1 }
 0x7c0   :  { %v1801_v29 = vmul.f32 -1.442695, %v916_v27 }
 0x7c2   :  { %2177 = vpow2.f32 %v1801_v29 }
 0x7c3   :  { %2179 = vtanh.f32 %v916_v27 }
 0x7cf   :  { %v2178_v30 = vpop.eup %2177 }
 0x7d0   :  { %v922_v31 = vadd.f32 1.0, %v2178_v30  ;;  %v2180_v32 = vpop.eup %2179 }
 0x7d1   :  { %v927_v34 = vadd.f32 %v2180_v32, %v926_v33 }
 0x7d2   :  { %2181 = vrcp.f32 %v922_v31 }
 0x7df   :  { %v2182_v37 = vpop.eup %2181 }
 0x7e0   :  { %v928_v38 = vmul.f32 %v2182_v37, %v927_v34 }
 0x7e2   :  { %2183 = vtanh.f32 %v928_v38  ;;  %931 = vst.msk [vmem:[#allocation3] sm:$0xff] %vm171_vm1, %v928_v38 }
 0x7e9   :  { %v1019_v49 = vld [vmem:[#allocation3] sm:$0xff] }
 0x7ef   :  { %v2184_v39 = vpop.eup %2183 }
 0x7f0   :  { %v930_v40 = vmul.f32 %v2184_v39, %v2182_v37 }
 0x7f2   :  { %932 = vst.msk [vmem:[#allocation2] sm:$0xff] %vm171_vm1, %v930_v40 }
 0x7f9   :  { %v934_v41 = vld [vmem:[#allocation2] sm:$0xff] }
 0x7fa   :  { %2028 = vmatmul.mubr.msk.f32.vlgmr.msra.gmra.mxu0 %vm171_vm1, %v934_v41 }
 0x7fb   :  { %2042 = vmatpush3.msra.mxu0 %v2322_v3  ;;  %2049 = vmatprep.mubr.msk.f32.mxu0 %vm2272_vm2, %v2271_v5 }
 0x7fc   :  { %2043 = vmatprep.subr.mxu0 %v2271_v5 }
 0x7fd   :  { %2044 = vmatpush3.msra.mxu0 %v2331_v6 }
 0x7fe   :  { %2045 = vmatprep.subr.mxu0 %v2271_v5 }
 0x7ff   :  { %2046 = vmatpush3.msra.mxu0 %v2342_v7 }
 0x800   :  { %2047 = vmatprep.subr.mxu0 %v2271_v5 }
 0x801   :  { %2048 = vmatpush3.msra.mxu0 %v2350_v8 }
 0x802   :  { %2063 = vmatprep.subr.mxu0 %v2271_v5 }
 0x8ba   :  { %v1008_v42 = vpop.f32.mrf.mxu0 }
 0x8bb   :  { %v1009_v43 = vadd.f32 %v1008_v42, %v2387_v17 }
 0x8bc   :  { %v2029_v44 = vpop.f32.mrf.mxu0 }
 0x8bd   :  { %v1803_v45 = vmul.f32 -1.442695, %v1009_v43 }
 0x8bf   :  { %2185 = vpow2.f32 %v1803_v45 }
 0x8c0   :  { %2187 = vtanh.f32 %v1009_v43 }
 0x8cc   :  { %v2186_v46 = vpop.eup %2185 }
 0x8cd   :  { %v1015_v47 = vadd.f32 1.0, %v2186_v46  ;;  %v2188_v48 = vpop.eup %2187 }
 0x8ce   :  { %v1020_v50 = vadd.f32 %v2188_v48, %v1019_v49 }
 0x8cf   :  { %2189 = vrcp.f32 %v1015_v47 }
 0x8dc   :  { %v2190_v52 = vpop.eup %2189 }
 0x8dd   :  { %v1021_v53 = vmul.f32 %v2190_v52, %v1020_v50 }
 0x8df   :  { %2191 = vtanh.f32 %v1021_v53  ;;  %1024 = vst.msk [vmem:[#allocation3] sm:$0xff] %vm171_vm1, %v1021_v53 }
 0x8e6   :  { %v1112_v0 = vld [vmem:[#allocation3] sm:$0xff] }
 0x8ec   :  { %v2192_v54 = vpop.eup %2191 }
 0x8ed   :  { %v1023_v55 = vmul.f32 %v2192_v54, %v2190_v52 }
 0x8ef   :  { %1025 = vst.msk [vmem:[#allocation2] sm:$0xff] %vm171_vm1, %v1023_v55 }
 0x8f6   :  { %v1027_v17 = vld [vmem:[#allocation2] sm:$0xff] }
 0x8f7   :  { %2039 = vmatmul.mubr.msk.f32.vlgmr.msra.gmra.mxu1 %vm171_vm1, %v1027_v17 }
 0x8f8   :  { %2053 = vmatpush3.msra.mxu1 %v2322_v3  ;;  %2060 = vmatprep.mubr.msk.f32.mxu1 %vm2272_vm2, %v2271_v5 }
 0x8f9   :  { %2054 = vmatprep.subr.mxu1 %v2271_v5 }
 0x8fa   :  { %2055 = vmatpush3.msra.mxu1 %v2331_v6 }
 0x8fb   :  { %2056 = vmatprep.subr.mxu1 %v2271_v5 }
 0x8fc   :  { %2057 = vmatpush3.msra.mxu1 %v2342_v7 }
 0x8fd   :  { %2058 = vmatprep.subr.mxu1 %v2271_v5 }
 0x8fe   :  { %2059 = vmatpush3.msra.mxu1 %v2350_v8 }
 0x8ff   :  { %2074 = vmatprep.subr.mxu1 %v2271_v5 }
 0x9b7   :  { %v1101_v56 = vpop.f32.mrf.mxu1 }
 0x9b8   :  { %v1102_v57 = vadd.f32 %v1101_v56, %v2429_v36 }
 0x9b9   :  { %v2040_v58 = vpop.f32.mrf.mxu1 }
 0x9ba   :  { %v1805_v59 = vmul.f32 -1.442695, %v1102_v57 }
 0x9bc   :  { %2193 = vpow2.f32 %v1805_v59 }
 0x9bd   :  { %2195 = vtanh.f32 %v1102_v57 }
 0x9c9   :  { %v2194_v60 = vpop.eup %2193 }
 0x9ca   :  { %v1108_v61 = vadd.f32 1.0, %v2194_v60  ;;  %v2196_v62 = vpop.eup %2195 }
 0x9cb   :  { %v1113_v1 = vadd.f32 %v2196_v62, %v1112_v0 }
 0x9cc   :  { %2197 = vrcp.f32 %v1108_v61 }
 0x9d9   :  { %v2198_v2 = vpop.eup %2197 }
 0x9da   :  { %v1114_v9 = vmul.f32 %v2198_v2, %v1113_v1 }
 0x9dc   :  { %2199 = vtanh.f32 %v1114_v9  ;;  %1117 = vst.msk [vmem:[#allocation3] sm:$0xff] %vm171_vm1, %v1114_v9 }
 0x9e3   :  { %v1205_v21 = vld [vmem:[#allocation3] sm:$0xff] }
 0x9e9   :  { %v2200_v11 = vpop.eup %2199 }
 0x9ea   :  { %v1116_v12 = vmul.f32 %v2200_v11, %v2198_v2 }
 0x9ec   :  { %1118 = vst.msk [vmem:[#allocation2] sm:$0xff] %vm171_vm1, %v1116_v12 }
 0x9f3   :  { %v1120_v36 = vld [vmem:[#allocation2] sm:$0xff] }
 0x9f4   :  { %2050 = vmatmul.mubr.msk.f32.vlgmr.msra.gmra.mxu0 %vm171_vm1, %v1120_v36 }
 0x9f5   :  { %2064 = vmatpush3.msra.mxu0 %v2322_v3  ;;  %2071 = vmatprep.mubr.msk.f32.mxu0 %vm2272_vm2, %v2271_v5 }
 0x9f6   :  { %2065 = vmatprep.subr.mxu0 %v2271_v5 }
 0x9f7   :  { %2066 = vmatpush3.msra.mxu0 %v2331_v6 }
 0x9f8   :  { %2067 = vmatprep.subr.mxu0 %v2271_v5 }
 0x9f9   :  { %2068 = vmatpush3.msra.mxu0 %v2342_v7 }
 0x9fa   :  { %2069 = vmatprep.subr.mxu0 %v2271_v5 }
 0x9fb   :  { %2070 = vmatpush3.msra.mxu0 %v2350_v8 }
 0x9fc   :  { %2085 = vmatprep.subr.mxu0 %v2271_v5 }
 0xab4   :  { %v1194_v13 = vpop.f32.mrf.mxu0 }
 0xab5   :  { %v1195_v14 = vadd.f32 %v1194_v13, %v2457_v63 }
 0xab6   :  { %v2051_v15 = vpop.f32.mrf.mxu0 }
 0xab7   :  { %v1807_v16 = vmul.f32 -1.442695, %v1195_v14 }
 0xab9   :  { %2201 = vpow2.f32 %v1807_v16 }
 0xaba   :  { %2203 = vtanh.f32 %v1195_v14 }
 0xac6   :  { %v2202_v10 = vpop.eup %2201 }
 0xac7   :  { %v1201_v18 = vadd.f32 1.0, %v2202_v10  ;;  %v2204_v19 = vpop.eup %2203 }
 0xac8   :  { %v1206_v22 = vadd.f32 %v2204_v19, %v1205_v21 }
 0xac9   :  { %2205 = vrcp.f32 %v1201_v18 }
 0xad6   :  { %v2206_v23 = vpop.eup %2205 }
 0xad7   :  { %v1207_v24 = vmul.f32 %v2206_v23, %v1206_v22  ;;  %v1681_v22 = vld [vmem:[%s2662_s4 + $0x18] sm:$0xff] }
 0xad9   :  { %2207 = vtanh.f32 %v1207_v24  ;;  %1210 = vst.msk [vmem:[#allocation3] sm:$0xff] %vm171_vm1, %v1207_v24  ;;  %v1679_v24 = vld [vmem:[%s2662_s4 + $0x8] sm:$0xff] }
 0xae0   :  { %v1298_v37 = vld [vmem:[#allocation3] sm:$0xff] }
 0xae6   :  { %v2208_v26 = vpop.eup %2207 }
 0xae7   :  { %v1209_v27 = vmul.f32 %v2208_v26, %v2206_v23  ;;  %v1680_v23 = vld [vmem:[%s2662_s4 + $0x10] sm:$0xff]  ;;  %v1678_v26 = vld [vmem:[%s2662_s4] sm:$0xff] }
 0xae9   :  { %1211 = vst.msk [vmem:[#allocation2] sm:$0xff] %vm171_vm1, %v1209_v27 }
 0xaf0   :  { %v1213_v63 = vld [vmem:[#allocation2] sm:$0xff] }
 0xaf1   :  { %2061 = vmatmul.mubr.msk.f32.vlgmr.msra.gmra.mxu1 %vm171_vm1, %v1213_v63 }
 0xaf2   :  { %2075 = vmatpush3.msra.mxu1 %v2322_v3  ;;  %2082 = vmatprep.mubr.msk.f32.mxu1 %vm2272_vm2, %v2271_v5 }
 0xaf3   :  { %2076 = vmatprep.subr.mxu1 %v2271_v5 }
 0xaf4   :  { %2077 = vmatpush3.msra.mxu1 %v2331_v6 }
 0xaf5   :  { %2078 = vmatprep.subr.mxu1 %v2271_v5 }
 0xaf6   :  { %2079 = vmatpush3.msra.mxu1 %v2342_v7 }
 0xaf7   :  { %2080 = vmatprep.subr.mxu1 %v2271_v5 }
 0xaf8   :  { %2081 = vmatpush3.msra.mxu1 %v2350_v8 }
 0xaf9   :  { %2096 = vmatprep.subr.mxu1 %v2271_v5 }
 0xbb1   :  { %v1287_v28 = vpop.f32.mrf.mxu1 }
 0xbb2   :  { %v1288_v29 = vadd.f32 %v1287_v28, %v2473_v20 }
 0xbb3   :  { %v2062_v30 = vpop.f32.mrf.mxu1 }
 0xbb4   :  { %v1809_v31 = vmul.f32 -1.442695, %v1288_v29 }
 0xbb6   :  { %2209 = vpow2.f32 %v1809_v31 }
 0xbb7   :  { %2211 = vtanh.f32 %v1288_v29 }
 0xbc3   :  { %v2210_v32 = vpop.eup %2209 }
 0xbc4   :  { %v1294_v33 = vadd.f32 1.0, %v2210_v32  ;;  %v2212_v34 = vpop.eup %2211 }
 0xbc5   :  { %v1299_v38 = vadd.f32 %v2212_v34, %v1298_v37 }
 0xbc6   :  { %2213 = vrcp.f32 %v1294_v33 }
 0xbd3   :  { %v2214_v39 = vpop.eup %2213 }
 0xbd4   :  { %v1300_v40 = vmul.f32 %v2214_v39, %v1299_v38 }
 0xbd6   :  { %2215 = vtanh.f32 %v1300_v40  ;;  %1303 = vst.msk [vmem:[#allocation3] sm:$0xff] %vm171_vm1, %v1300_v40  ;;  %v1818_v40 = vld [vmem:[%s2663_s5] ss:$0 sm:$0xff] }
 0xbdd   :  { %v1391_v50 = vld [vmem:[#allocation3] sm:$0xff] }
 0xbe3   :  { %v2216_v41 = vpop.eup %2215 }
 0xbe4   :  { %v1302_v42 = vmul.f32 %v2216_v41, %v2214_v39 }
 0xbe6   :  { %1304 = vst.msk [vmem:[#allocation2] sm:$0xff] %vm171_vm1, %v1302_v42 }
 0xbed   :  { %v1306_v20 = vld [vmem:[#allocation2] sm:$0xff] }
 0xbee   :  { %2072 = vmatmul.mubr.msk.f32.vlgmr.msra.gmra.mxu0 %vm171_vm1, %v1306_v20 }
 0xbef   :  { %2086 = vmatpush3.msra.mxu0 %v2322_v3  ;;  %2093 = vmatprep.mubr.msk.f32.mxu0 %vm2272_vm2, %v2271_v5 }
 0xbf0   :  { %2087 = vmatprep.subr.mxu0 %v2271_v5 }
 0xbf1   :  { %2088 = vmatpush3.msra.mxu0 %v2331_v6 }
 0xbf2   :  { %2089 = vmatprep.subr.mxu0 %v2271_v5 }
 0xbf3   :  { %2090 = vmatpush3.msra.mxu0 %v2342_v7 }
 0xbf4   :  { %2091 = vmatprep.subr.mxu0 %v2271_v5 }
 0xbf5   :  { %2092 = vmatpush3.msra.mxu0 %v2350_v8 }
 0xbf6   :  { %2107 = vmatprep.subr.mxu0 %v2271_v5 }
 0xcae   :  { %v1380_v43 = vpop.f32.mrf.mxu0 }
 0xcaf   :  { %v1381_v44 = vadd.f32 %v1380_v43, %v2489_v35 }
 0xcb0   :  { %v2073_v45 = vpop.f32.mrf.mxu0 }
 0xcb1   :  { %v1811_v46 = vmul.f32 -1.442695, %v1381_v44 }
 0xcb3   :  { %2217 = vpow2.f32 %v1811_v46 }
 0xcb4   :  { %2219 = vtanh.f32 %v1381_v44 }
 0xcc0   :  { %v2218_v47 = vpop.eup %2217 }
 0xcc1   :  { %v1387_v48 = vadd.f32 1.0, %v2218_v47  ;;  %v2220_v49 = vpop.eup %2219 }
 0xcc2   :  { %v1392_v52 = vadd.f32 %v2220_v49, %v1391_v50 }
 0xcc3   :  { %2221 = vrcp.f32 %v1387_v48 }
 0xcd0   :  { %v2222_v53 = vpop.eup %2221 }
 0xcd1   :  { %v1393_v54 = vmul.f32 %v2222_v53, %v1392_v52 }
 0xcd3   :  { %2223 = vtanh.f32 %v1393_v54  ;;  %1396 = vst.msk [vmem:[#allocation3] sm:$0xff] %vm171_vm1, %v1393_v54 }
 0xce0   :  { %v2224_v55 = vpop.eup %2223 }
 0xce1   :  { %v1395_v17 = vmul.f32 %v2224_v55, %v2222_v53 }
 0xce3   :  { %1397 = vst.msk [vmem:[#allocation2] sm:$0xff] %vm171_vm1, %v1395_v17 }
 0xcea   :  { %v1399_v35 = vld [vmem:[#allocation2] sm:$0xff] }
 0xceb   :  { %2083 = vmatmul.mubr.msk.f32.vlgmr.msra.gmra.mxu1 %vm171_vm1, %v1399_v35 }
 0xcec   :  { %2097 = vmatpush3.msra.mxu1 %v2322_v3  ;;  %2104 = vmatprep.mubr.msk.f32.mxu1 %vm2272_vm2, %v2271_v5 }
 0xced   :  { %2098 = vmatprep.subr.mxu1 %v2271_v5 }
 0xcee   :  { %2099 = vmatpush3.msra.mxu1 %v2331_v6  ;;  %v1484_v6 = vld [vmem:[#allocation3] sm:$0xff] }
 0xcef   :  { %2100 = vmatprep.subr.mxu1 %v2271_v5 }
 0xcf0   :  { %2101 = vmatpush3.msra.mxu1 %v2342_v7 }
 0xcf1   :  { %2102 = vmatprep.subr.mxu1 %v2271_v5 }
 0xcf2   :  { %2103 = vmatpush3.msra.mxu1 %v2350_v8 }
 0xdab   :  { %v1473_v56 = vpop.f32.mrf.mxu1 }
 0xdac   :  { %v1474_v57 = vadd.f32 %v1473_v56, %v2505_v51 }
 0xdad   :  { %v2084_v58 = vpop.f32.mrf.mxu1 }
 0xdae   :  { %v1813_v3 = vmul.f32 -1.442695, %v1474_v57 }
 0xdb0   :  { %2225 = vpow2.f32 %v1813_v3 }
 0xdb1   :  { %2227 = vtanh.f32 %v1474_v57 }
 0xdbd   :  { %v2226_v59 = vpop.eup %2225 }
 0xdbe   :  { %v1480_v60 = vadd.f32 1.0, %v2226_v59  ;;  %v2228_v61 = vpop.eup %2227 }
 0xdbf   :  { %v1485_v62 = vadd.f32 %v2228_v61, %v1484_v6 }
 0xdc0   :  { %2229 = vrcp.f32 %v1480_v60 }
 0xdcd   :  { %v2230_v0 = vpop.eup %2229 }
 0xdce   :  { %v1486_v1 = vmul.f32 %v2230_v0, %v1485_v62 }
 0xdd0   :  { %2231 = vtanh.f32 %v1486_v1  ;;  %1489 = vst.msk [vmem:[#allocation3] sm:$0xff] %vm171_vm1, %v1486_v1 }
 0xdd7   :  { %v1577_v15 = vld [vmem:[#allocation3] sm:$0xff] }
 0xddd   :  { %v2232_v7 = vpop.eup %2231 }
 0xdde   :  { %v1488_v8 = vmul.f32 %v2232_v7, %v2230_v0 }
 0xde0   :  { %1490 = vst.msk [vmem:[#allocation2] sm:$0xff] %vm171_vm1, %v1488_v8 }
 0xde7   :  { %v1492_v51 = vld [vmem:[#allocation2] sm:$0xff] }
 0xde8   :  { %2094 = vmatmul.mubr.msk.f32.vlgmr.msra.gmra.mxu0 %vm171_vm1, %v1492_v51 }
 0xde9   :  { %2115 = vmatprep.mubr.msk.f32.mxu0 %vm2272_vm2, %v2271_v5  ;;  %2108 = vmatpush3.msra.mxu0 %v1681_v22 }
 0xdea   :  { %2109 = vmatprep.subr.mxu0 %v2271_v5 }
 0xdeb   :  { %2110 = vmatpush3.msra.mxu0 %v1680_v23 }
 0xdec   :  { %2111 = vmatprep.subr.mxu0 %v2271_v5 }
 0xded   :  { %2112 = vmatpush3.msra.mxu0 %v1679_v24 }
 0xdee   :  { %2113 = vmatprep.subr.mxu0 %v2271_v5 }
 0xdef   :  { %2114 = vmatpush3.msra.mxu0 %v1678_v26 }
 0xea8   :  { %v1566_v2 = vpop.f32.mrf.mxu0 }
 0xea9   :  { %v1567_v9 = vadd.f32 %v1566_v2, %v2521_v4 }
 0xeaa   :  { %v2095_v11 = vpop.f32.mrf.mxu0 }
 0xeab   :  { %v1815_v12 = vmul.f32 -1.442695, %v1567_v9 }
 0xead   :  { %2233 = vpow2.f32 %v1815_v12 }
 0xeae   :  { %2235 = vtanh.f32 %v1567_v9 }
 0xeba   :  { %v2234_v36 = vpop.eup %2233 }
 0xebb   :  { %v1573_v13 = vadd.f32 1.0, %v2234_v36  ;;  %v2236_v14 = vpop.eup %2235 }
 0xebc   :  { %v1578_v16 = vadd.f32 %v2236_v14, %v1577_v15 }
 0xebd   :  { %2237 = vrcp.f32 %v1573_v13 }
 0xeca   :  { %v2238_v10 = vpop.eup %2237 }
 0xecb   :  { %v1579_v18 = vmul.f32 %v2238_v10, %v1578_v16 }
 0xecd   :  { %2239 = vtanh.f32 %v1579_v18  ;;  %1582 = vst.msk [vmem:[#allocation3] sm:$0xff] %vm171_vm1, %v1579_v18 }
 0xed4   :  { %v1670_v33 = vld [vmem:[#allocation3] sm:$0xff] }
 0xeda   :  { %v2240_v19 = vpop.eup %2239 }
 0xedb   :  { %v1581_v21 = vmul.f32 %v2240_v19, %v2238_v10 }
 0xedd   :  { %1583 = vst.msk [vmem:[#allocation2] sm:$0xff] %vm171_vm1, %v1581_v21 }
 0xee4   :  { %v1585_v4 = vld [vmem:[#allocation2] sm:$0xff] }
 0xee5   :  { %2105 = vmatmul.mubr.msk.f32.vlgmr.msra.gmra.mxu1 %vm171_vm1, %v1585_v4 }
 0xfa5   :  { %v1659_v27 = vpop.f32.mrf.mxu1 }
 0xfa6   :  { %v1660_v63 = vadd.f32 %v1659_v27, %v2537_v25 }
 0xfa7   :  { %v2106_v28 = vpop.f32.mrf.mxu1 }
 0xfa8   :  { %v1817_v29 = vmul.f32 -1.442695, %v1660_v63 }
 0xfaa   :  { %2241 = vpow2.f32 %v1817_v29 }
 0xfab   :  { %2243 = vtanh.f32 %v1660_v63 }
 0xfb7   :  { %v2242_v30 = vpop.eup %2241 }
 0xfb8   :  { %v1666_v31 = vadd.f32 1.0, %v2242_v30  ;;  %v2244_v32 = vpop.eup %2243 }
 0xfb9   :  { %v1671_v34 = vadd.f32 %v2244_v32, %v1670_v33 }
 0xfba   :  { %2245 = vrcp.f32 %v1666_v31 }
 0xfc7   :  { %v2246_v37 = vpop.eup %2245 }
 0xfc8   :  { %v1672_v38 = vmul.f32 %v2246_v37, %v1671_v34 }
 0xfca   :  { %2247 = vtanh.f32 %v1672_v38  ;;  %1675 = vst.msk [vmem:[#allocation3] sm:$0xff] %vm171_vm1, %v1672_v38 }
 0xfd7   :  { %v2248_v5 = vpop.eup %2247 }
 0xfd8   :  { %v1674_v39 = vmul.f32 %v2248_v5, %v2246_v37 }
 0xfda   :  { %1676 = vst.msk [vmem:[#allocation2] sm:$0xff] %vm171_vm1, %v1674_v39 }
 0xfe1   :  { %v1677_v25 = vld [vmem:[#allocation2] sm:$0xff] }
 0xfe2   :  { %2116 = vmatmul.mubr.msk.f32.vlgmr.msra.gmra.mxu0 %vm171_vm1, %v1677_v25 }
0x10a2   :  { %v1758_v41 = vpop.f32.mrf.mxu0 }
0x10a3   :  { %v1759_v42 = vadd.f32 %v1818_v40, %v1758_v41 }
0x10a4   :  { %v2117_v20 = vpop.f32.mrf.mxu0 }
0x10a5   :  { %1762 = vst.msk [vmem:[#allocation5] sm:$0xff] %vm41_vm0, %v1759_v42 }
0x10a6   :  { %2260 = shalt.err (!%p2257_p4)
}
0x10a7   :  { %1772 = dma.vmem_to_hbm [thread:$0]  %s1770_s8, 128, %s2664_s6, [#allocation6]  }
0x10a8   :  { %2269 = dma.done.wait [#allocation6], 128  }
0x10a9   :  { %2270 = vsyncadd [#allocation6], 4294967168 }
0x10aa   :  { %1776 = vsyncpa [#allocation6], 1 }

</bundles_post_ra>
